<compile_context>
chip_gen: v5e
topology: v5e:2x2
jax: 0.10.0
libtpu: 0.0.40
codegen_flags: <defaults>
</compile_context>

<pallas_src>
import jax
import jax.numpy as jnp
from jax.experimental import pallas as pl
from jax.experimental.pallas import tpu as pltpu

INPUT_SIZE = 28 * 28       # 784
HIDDEN_SIZE = 500          # logical hidden size (PyTorch module)
HIDDEN_PAD = 512           # padded to 4*128 for clean lane/sublane tiling
NUM_CLASSES = 10           # logical number of classes
OUT_PAD = 128              # padded output width -> unmasked lane-dense stores
BLOCK_B = 256              # batch tile (multiple of 128; MXU-row friendly)


def _round_up(n, m):
    return ((n + m - 1) // m) * m


def mnet_kernel(x_ref, w1_ref, b1_ref, w2_ref, b2_ref, o_ref):
    # fc1: (TB, 784)bf16 @ (784, 512)bf16 -> f32 accumulate, + bias, ReLU
    h = jnp.dot(x_ref[...], w1_ref[...], preferred_element_type=jnp.float32)
    h = jnp.maximum(h + b1_ref[...], 0.0)
    # fc2: (TB, 512)bf16 @ (512, 128)bf16 -> f32 accumulate, + bias
    out = jnp.dot(h.astype(jnp.bfloat16), w2_ref[...],
                  preferred_element_type=jnp.float32)
    o_ref[...] = (out + b2_ref[...]).astype(o_ref.dtype)


def mnet_forward(x, w1_p, b1_p, w2_p, b2_p, *, block_b=BLOCK_B):
    """x: (B, 784) float. Padded params:
         w1_p: (784, 512) bf16, b1_p: (1, 512) f32,
         w2_p: (512, 128) bf16, b2_p: (1, 128) f32.
       Returns logits (B, 10) f32."""
    B = x.shape[0]
    # Batch tile: multiple of 8 sublanes, capped at block_b; pad B up to a
    # whole number of tiles (padded rows produce garbage logits we slice off).
    tb = min(block_b, _round_up(B, 8))
    B_pad = _round_up(B, tb)
    if B_pad != B:
        x = jnp.pad(x, ((0, B_pad - B), (0, 0)))
    x = x.astype(jnp.bfloat16)

    grid = (B_pad // tb,)
    out = pl.pallas_call(
        mnet_kernel,
        out_shape=jax.ShapeDtypeStruct((B_pad, OUT_PAD), jnp.float32),
        grid_spec=pltpu.PrefetchScalarGridSpec(
            num_scalar_prefetch=0,
            grid=grid,
            in_specs=[
                # x: new tile per grid step (double-buffered).
                pl.BlockSpec((tb, INPUT_SIZE), lambda i: (i, 0)),
                # Weights / biases: constant block index -> DMA'd once,
                # VMEM-resident across all batch tiles.
                pl.BlockSpec((INPUT_SIZE, HIDDEN_PAD), lambda i: (0, 0)),
                pl.BlockSpec((1, HIDDEN_PAD), lambda i: (0, 0)),
                pl.BlockSpec((HIDDEN_PAD, OUT_PAD), lambda i: (0, 0)),
                pl.BlockSpec((1, OUT_PAD), lambda i: (0, 0)),
            ],
            out_specs=pl.BlockSpec((tb, OUT_PAD), lambda i: (i, 0)),
        ),
        compiler_params=pltpu.CompilerParams(
            dimension_semantics=("parallel",)),
    )(x, w1_p, b1_p, w2_p, b2_p)
    return out[:B, :NUM_CLASSES]


def init_params(key):
    """PyTorch nn.Linear-style uniform init at logical sizes, then zero-pad to
    the TPU-friendly shapes and cast weights to bf16.

    Returned layout: W stored as (in, out) so the kernel computes x @ W
    (== x @ W_pt.T). Padded hidden/output columns are exactly zero so
    ReLU(h_pad) = 0 and the extra logits are exactly zero."""
    k1, k2, k3, k4 = jax.random.split(key, 4)
    bound1 = 1.0 / jnp.sqrt(INPUT_SIZE)
    w1 = jax.random.uniform(k1, (INPUT_SIZE, HIDDEN_SIZE), jnp.float32,
                            -bound1, bound1)
    b1 = jax.random.uniform(k2, (1, HIDDEN_SIZE), jnp.float32,
                            -bound1, bound1)
    bound2 = 1.0 / jnp.sqrt(HIDDEN_SIZE)
    w2 = jax.random.uniform(k3, (HIDDEN_SIZE, NUM_CLASSES), jnp.float32,
                            -bound2, bound2)
    b2 = jax.random.uniform(k4, (1, NUM_CLASSES), jnp.float32,
                            -bound2, bound2)

    # Zero-pad to (784, 512) / (1, 512) / (512, 128) / (1, 128).
    w1_p = jnp.pad(w1, ((0, 0), (0, HIDDEN_PAD - HIDDEN_SIZE)))
    b1_p = jnp.pad(b1, ((0, 0), (0, HIDDEN_PAD - HIDDEN_SIZE)))
    w2_p = jnp.pad(w2, ((0, HIDDEN_PAD - HIDDEN_SIZE),
                        (0, OUT_PAD - NUM_CLASSES)))
    b2_p = jnp.pad(b2, ((0, 0), (0, OUT_PAD - NUM_CLASSES)))

    return (w1_p.astype(jnp.bfloat16), b1_p,
            w2_p.astype(jnp.bfloat16), b2_p)


def _reference(x, w1_p, b1_p, w2_p, b2_p):
    """Pure-JAX reference mirroring the kernel's bf16 casts (f32 math)."""
    xb = x.astype(jnp.bfloat16).astype(jnp.float32)
    h = jnp.maximum(xb @ w1_p.astype(jnp.float32) + b1_p, 0.0)
    hb = h.astype(jnp.bfloat16).astype(jnp.float32)
    out = hb @ w2_p.astype(jnp.float32) + b2_p
    return out[:, :NUM_CLASSES]


if __name__ == "__main__":
    key = jax.random.PRNGKey(0)
    kx, kp = jax.random.split(key)
    w1_p, b1_p, w2_p, b2_p = init_params(kp)

    # Small batch (single tile).
    B = 8
    x = jax.random.normal(kx, (B, INPUT_SIZE), jnp.float32)
    logits = mnet_forward(x, w1_p, b1_p, w2_p, b2_p)
    jax.block_until_ready(logits)
    ref = _reference(x, w1_p, b1_p, w2_p, b2_p)
    assert logits.shape == (B, NUM_CLASSES)
    assert jnp.allclose(logits, ref, atol=1e-2, rtol=1e-2)

    # Non-multiple batch (exercises tiling, padding, resident-weight reuse).
    B2 = 260
    x2 = jax.random.normal(kx, (B2, INPUT_SIZE), jnp.float32)
    logits2 = mnet_forward(x2, w1_p, b1_p, w2_p, b2_p)
    jax.block_until_ready(logits2)
    ref2 = _reference(x2, w1_p, b1_p, w2_p, b2_p)
    assert logits2.shape == (B2, NUM_CLASSES)
    assert jnp.allclose(logits2, ref2, atol=1e-2, rtol=1e-2)

    print("KERNEL_OK")
</pallas_src>

<mosaic_0001>
module attributes {stable_mosaic.version = 11 : i64} {
  func.func @mnet_kernel(%arg0: i32, %arg1: memref<8x784xbf16, #tpu.memory_space<vmem>>, %arg2: memref<784x512xbf16, #tpu.memory_space<vmem>>, %arg3: memref<1x512xf32, #tpu.memory_space<vmem>>, %arg4: memref<512x128xbf16, #tpu.memory_space<vmem>>, %arg5: memref<1x128xf32, #tpu.memory_space<vmem>>, %arg6: memref<8x128xf32, #tpu.memory_space<vmem>>) attributes {dimension_semantics = [#tpu.dimension_semantics<parallel>], iteration_bounds = array<i64: 1>, scalar_prefetch = 0 : i64, scratch_operands = 0 : i64, tpu.core_type = #tpu.core_type<tc>, window_params = [{transform_indices = @transform_0, window_bounds = array<i64: 8, 784>}, {pipeline_mode = #tpu.pipeline_mode<synchronous>, transform_indices = @transform_1, window_bounds = array<i64: 784, 512>}, {pipeline_mode = #tpu.pipeline_mode<synchronous>, transform_indices = @transform_2, window_bounds = array<i64: 1, 512>}, {pipeline_mode = #tpu.pipeline_mode<synchronous>, transform_indices = @transform_3, window_bounds = array<i64: 512, 128>}, {pipeline_mode = #tpu.pipeline_mode<synchronous>, transform_indices = @transform_4, window_bounds = array<i64: 1, 128>}, {transform_indices = @transform_5, window_bounds = array<i64: 8, 128>}]} {
    %c0 = arith.constant 0 : index
    %c0_0 = arith.constant 0 : index
    %0 = vector.load %arg1[%c0, %c0_0] : memref<8x784xbf16, #tpu.memory_space<vmem>>, vector<8x784xbf16>
    %c0_1 = arith.constant 0 : index
    %c0_2 = arith.constant 0 : index
    %1 = vector.load %arg2[%c0_1, %c0_2] : memref<784x512xbf16, #tpu.memory_space<vmem>>, vector<784x512xbf16>
    %cst = arith.constant dense<0.000000e+00> : vector<8x512xf32>
    %2 = tpu.matmul %0, %1, %cst {dimension_numbers = #tpu.dot_dimension_numbers<[1], [0], [0], [1], [0, 0, 1, 1], [], []>} : vector<8x784xbf16>, vector<784x512xbf16>, vector<8x512xf32> -> vector<8x512xf32>
    %c0_3 = arith.constant 0 : index
    %c0_4 = arith.constant 0 : index
    %3 = vector.load %arg3[%c0_3, %c0_4] : memref<1x512xf32, #tpu.memory_space<vmem>>, vector<1x512xf32>
    %4 = vector.broadcast %3 : vector<1x512xf32> to vector<8x512xf32>
    %5 = arith.addf %2, %4 : vector<8x512xf32>
    %cst_5 = arith.constant 0.000000e+00 : f32
    %6 = vector.broadcast %cst_5 : f32 to vector<8x512xf32>
    %7 = arith.maximumf %5, %6 : vector<8x512xf32>
    %8 = arith.truncf %7 : vector<8x512xf32> to vector<8x512xbf16>
    %c0_6 = arith.constant 0 : index
    %c0_7 = arith.constant 0 : index
    %9 = vector.load %arg4[%c0_6, %c0_7] : memref<512x128xbf16, #tpu.memory_space<vmem>>, vector<512x128xbf16>
    %cst_8 = arith.constant dense<0.000000e+00> : vector<8x128xf32>
    %10 = tpu.matmul %8, %9, %cst_8 {dimension_numbers = #tpu.dot_dimension_numbers<[1], [0], [0], [1], [0, 0, 1, 1], [], []>} : vector<8x512xbf16>, vector<512x128xbf16>, vector<8x128xf32> -> vector<8x128xf32>
    %c0_9 = arith.constant 0 : index
    %c0_10 = arith.constant 0 : index
    %11 = vector.load %arg5[%c0_9, %c0_10] : memref<1x128xf32, #tpu.memory_space<vmem>>, vector<1x128xf32>
    %12 = vector.broadcast %11 : vector<1x128xf32> to vector<8x128xf32>
    %13 = arith.addf %10, %12 : vector<8x128xf32>
    %c0_11 = arith.constant 0 : index
    %c0_12 = arith.constant 0 : index
    %14 = vector.load %arg6[%c0_11, %c0_12] : memref<8x128xf32, #tpu.memory_space<vmem>>, vector<8x128xf32>
    tpu.vector_store %arg6[%c0_11, %c0_12], %13 {strides = array<i32>} : memref<8x128xf32, #tpu.memory_space<vmem>>, vector<8x128xf32>,
    return
  }
  func.func @transform_0(%arg0: i32) -> (i32, i32) {
    %c0_i32 = arith.constant 0 : i32
    %c0_i32_0 = arith.constant 0 : i32
    return %arg0, %c0_i32 : i32, i32
  }
  func.func @transform_1(%arg0: i32) -> (i32, i32) {
    %c0_i32 = arith.constant 0 : i32
    %c0_i32_0 = arith.constant 0 : i32
    %c0_i32_1 = arith.constant 0 : i32
    return %c0_i32, %c0_i32_0 : i32, i32
  }
  func.func @transform_2(%arg0: i32) -> (i32, i32) {
    %c0_i32 = arith.constant 0 : i32
    %c0_i32_0 = arith.constant 0 : i32
    %c0_i32_1 = arith.constant 0 : i32
    return %c0_i32, %c0_i32_0 : i32, i32
  }
  func.func @transform_3(%arg0: i32) -> (i32, i32) {
    %c0_i32 = arith.constant 0 : i32
    %c0_i32_0 = arith.constant 0 : i32
    %c0_i32_1 = arith.constant 0 : i32
    return %c0_i32, %c0_i32_0 : i32, i32
  }
  func.func @transform_4(%arg0: i32) -> (i32, i32) {
    %c0_i32 = arith.constant 0 : i32
    %c0_i32_0 = arith.constant 0 : i32
    %c0_i32_1 = arith.constant 0 : i32
    return %c0_i32, %c0_i32_0 : i32, i32
  }
  func.func @transform_5(%arg0: i32) -> (i32, i32) {
    %c0_i32 = arith.constant 0 : i32
    %c0_i32_0 = arith.constant 0 : i32
    return %arg0, %c0_i32 : i32, i32
  }
}

</mosaic_0001>

<bundles_post_ra>
// kernel: tpu_custom_call.1
= control target key start
LH: loop header
LB: loop body
LE: loop exit
PB: predicated region body
PF: predicated region fallthrough
CT: control target
= control target key end

     0   :  { %10 = vsyncpa [#allocation3], 0  ;;  %s3406_s0 = inlined_call_operand.hbm [shape: bf16[8,784], index: 0, kind: input, shape index: {}]   ;;  %s3407_s1 = inlined_call_operand.hbm [shape: bf16[784,512], index: 1, kind: input, shape index: {}]   ;;  %s3408_s2 = inlined_call_operand.hbm [shape: f32[1,512], index: 2, kind: input, shape index: {}]   ;;  %s3409_s3 = inlined_call_operand.hbm [shape: bf16[512,128], index: 3, kind: input, shape index: {}]   ;;  %s3410_s4 = inlined_call_operand.vmem [shape: f32[1,128], index: 4, kind: input, shape index: {}]   ;;  %s3411_s5 = inlined_call_operand.hbm [shape: f32[8,128], index: 5, kind: output, shape index: {}]  }
   0x1   :  { %11 = vsyncpa [#allocation6], 0 }
   0x2   :  { %12 = vsyncpa [#allocation9], 0  ;;  %s29_s20 = sshll.u32 %s3407_s1, 4  ;;  %s30_s20 = int_to_ptr.hbm [resolvable:$true] %s29_s20 }
   0x3   :  { %13 = vsyncpa [#allocation4], 0  ;;  %s3285_s21 = smov [#allocation5]   ;;  %s19_s25 = sshll.u32 %s3406_s0, 4  ;;  %s20_s25 = int_to_ptr.hbm [resolvable:$true] %s19_s25 }
   0x4   :  { %s31_s22 = sshll.u32 %s3285_s21, 4  ;;  %s3286_s26 = smov 256   ;;  %s32_s22 = int_to_ptr.vmem [resolvable:$true] %s31_s22 }
   0x5   :  { %s3287_s27 = smov 16   ;;  %s3288_s28 = smov [#allocation2]  }
   0x6   :  { %37 = dma.hbm_to_vmem [thread:$0]  %s30_s20, 25088, %s32_s22, [#allocation6], %s3286_s26, %s3286_s26, %s3287_s27  }
   0x7   :  { %s21_s29 = sshll.u32 %s3288_s28, 4  ;;  %s43_s7 = sshll.u32 %s3408_s2, 4  ;;  %s22_s29 = int_to_ptr.vmem [resolvable:$true] %s21_s29  ;;  %s44_s7 = int_to_ptr.hbm [resolvable:$true] %s43_s7 }
   0x8   :  { %24 = dma.hbm_to_vmem [thread:$0]  %s20_s25, 448, %s22_s29, [#allocation3]  }
   0x9   :  { %s53_s9 = sshll.u32 %s3409_s3, 4  ;;  %s3289_s10 = smov [#allocation7]   ;;  %s54_s9 = int_to_ptr.hbm [resolvable:$true] %s53_s9 }
   0xa   :  { %s45_s11 = sshll.u32 %s3289_s10, 4  ;;  %s3290_s0 = smov [#allocation8]   ;;  %s46_s11 = int_to_ptr.vmem [resolvable:$true] %s45_s11 }
   0xb   :  { %48 = dma.hbm_to_vmem [thread:$0]  %s44_s7, 64, %s46_s11, [#allocation6]  }
   0xc   :  { %s55_s12 = sshll.u32 %s3290_s0, 4  ;;  %s3291_s13 = smov 64   ;;  %s56_s12 = int_to_ptr.vmem [resolvable:$true] %s55_s12 }
   0xd   :  { %s3292_s14 = smov 4  }
   0xe   :  { %61 = dma.hbm_to_vmem [thread:$0]  %s54_s9, 4096, %s56_s12, [#allocation9], %s3291_s13, %s3291_s13, %s3292_s14  }
   0xf   :  { %3277 = dma.done.wait [#allocation3], 448  }
  0x10   :  { %3278 = vsyncadd [#allocation3], 4294966848 }
  0x11   :  { %3279 = dma.done.wait [#allocation6], 25152  }
  0x12   :  { %3280 = vsyncadd [#allocation6], 4294942144 }
  0x13   :  { %3281 = dma.done.wait [#allocation9], 4096  }
  0x14   :  { %3282 = vsyncadd [#allocation9], 4294963200  ;;  %v2117_v0 = vld [vmem:[#allocation5 + $0xe0] sm:$0xf]  ;;  %v2949_v1 = vld [vmem:[#allocation5 + $0xec] sm:$0xf0] }
  0x15   :  { %v2245_v2 = vld [vmem:[#allocation5 + $0x1e0] sm:$0xf]  ;;  %v2118_v3 = vor.u32 %v2949_v1, %v2117_v0  ;;  %v2981_v4 = vld [vmem:[#allocation5 + $0x1ec] sm:$0xf0]  ;;  %vm1295_vm0 = vcmask 130048   ;;  %s3293_s15 = smov [#allocation10]  }
  0x16   :  { %v2373_v5 = vld [vmem:[#allocation5 + $0x2e0] sm:$0xf]  ;;  %v3013_v6 = vld [vmem:[#allocation5 + $0x2ec] sm:$0xf0]  ;;  %v2246_v7 = vor.u32 %v2981_v4, %v2245_v2  ;;  %s1989_s16 = sshll.u32 %s3293_s15, 4  ;;  %s1991_s19 = sshll.u32 %s3411_s5, 4  ;;  %s1990_s16 = int_to_ptr.vmem [resolvable:$true] %s1989_s16  ;;  %s1992_s19 = int_to_ptr.hbm [resolvable:$true] %s1991_s19 }
  0x17   :  { %v2374_v8 = vor.u32 %v3013_v6, %v2373_v5  ;;  %v2501_v9 = vld [vmem:[#allocation5 + $0x3e0] sm:$0xf]  ;;  %v3045_v10 = vld [vmem:[#allocation5 + $0x3ec] sm:$0xf0]  ;;  %1299 = vmatpush.bf16.msra.mxu0 %v2118_v3 }
  0x18   :  { %v2101_v11 = vld [vmem:[#allocation5 + $0xc0] sm:$0xf]  ;;  %v2502_v12 = vor.u32 %v3045_v10, %v2501_v9  ;;  %v2945_v13 = vld [vmem:[#allocation5 + $0xcc] sm:$0xf0]  ;;  %1312 = vmatpush.bf16.msra.mxu1 %v2246_v7 }
  0x19   :  { %v2229_v14 = vld [vmem:[#allocation5 + $0x1c0] sm:$0xf]  ;;  %v2977_v15 = vld [vmem:[#allocation5 + $0x1cc] sm:$0xf0]  ;;  %1325 = vmatpush.bf16.msra.mxu2 %v2374_v8  ;;  %v2102_v16 = vor.u32 %v2945_v13, %v2101_v11 }
  0x1a   :  { %v2230_v17 = vor.u32 %v2977_v15, %v2229_v14  ;;  %v2357_v18 = vld [vmem:[#allocation5 + $0x2c0] sm:$0xf]  ;;  %v3009_v19 = vld [vmem:[#allocation5 + $0x2cc] sm:$0xf0]  ;;  %1338 = vmatpush.bf16.msra.mxu3 %v2502_v12 }
  0x1b   :  { %v2485_v20 = vld [vmem:[#allocation5 + $0x3c0] sm:$0xf]  ;;  %v2358_v21 = vor.u32 %v3009_v19, %v2357_v18  ;;  %v3041_v22 = vld [vmem:[#allocation5 + $0x3cc] sm:$0xf0]  ;;  %1300 = vmatpush.bf16.msra.mxu0 %v2102_v16 }
  0x1c   :  { %v2085_v23 = vld [vmem:[#allocation5 + $0xa0] sm:$0xf]  ;;  %v2941_v24 = vld [vmem:[#allocation5 + $0xac] sm:$0xf0]  ;;  %v2486_v25 = vor.u32 %v3041_v22, %v2485_v20  ;;  %1313 = vmatpush.bf16.msra.mxu1 %v2230_v17 }
  0x1d   :  { %v2213_v26 = vld [vmem:[#allocation5 + $0x1a0] sm:$0xf]  ;;  %v2973_v27 = vld [vmem:[#allocation5 + $0x1ac] sm:$0xf0]  ;;  %v2086_v29 = vor.u32 %v2941_v24, %v2085_v23  ;;  %1326 = vmatpush.bf16.msra.mxu2 %v2358_v21 }
  0x1e   :  { %v2341_v28 = vld [vmem:[#allocation5 + $0x2a0] sm:$0xf]  ;;  %v3005_v30 = vld [vmem:[#allocation5 + $0x2ac] sm:$0xf0]  ;;  %v2214_v33 = vor.u32 %v2973_v27, %v2213_v26  ;;  %1339 = vmatpush.bf16.msra.mxu3 %v2486_v25 }
  0x1f   :  { %v2469_v31 = vld [vmem:[#allocation5 + $0x3a0] sm:$0xf]  ;;  %v3037_v32 = vld [vmem:[#allocation5 + $0x3ac] sm:$0xf0]  ;;  %v2342_v34 = vor.u32 %v3005_v30, %v2341_v28  ;;  %1301 = vmatpush.bf16.msra.mxu0 %v2086_v29 }
  0x20   :  { %v2069_v35 = vld [vmem:[#allocation5 + $0x80] sm:$0xf]  ;;  %v2937_v36 = vld [vmem:[#allocation5 + $0x8c] sm:$0xf0]  ;;  %v2470_v38 = vor.u32 %v3037_v32, %v2469_v31  ;;  %1314 = vmatpush.bf16.msra.mxu1 %v2214_v33 }
  0x21   :  { %v2197_v37 = vld [vmem:[#allocation5 + $0x180] sm:$0xf]  ;;  %v2969_v39 = vld [vmem:[#allocation5 + $0x18c] sm:$0xf0]  ;;  %v2070_v44 = vor.u32 %v2937_v36, %v2069_v35  ;;  %1327 = vmatpush.bf16.msra.mxu2 %v2342_v34  ;;  %v2947_v34 = vld [vmem:[#allocation5 + $0xe4] sm:$0xf] }
  0x22   :  { %v2325_v40 = vld [vmem:[#allocation5 + $0x280] sm:$0xf]  ;;  %v3001_v41 = vld [vmem:[#allocation5 + $0x28c] sm:$0xf0]  ;;  %v2198_v45 = vor.u32 %v2969_v39, %v2197_v37  ;;  %1340 = vmatpush.bf16.msra.mxu3 %v2470_v38  ;;  %v2119_v35 = vld [vmem:[#allocation5 + $0xf0] sm:$0xf0] }
  0x23   :  { %v2453_v42 = vld [vmem:[#allocation5 + $0x380] sm:$0xf]  ;;  %v3033_v43 = vld [vmem:[#allocation5 + $0x38c] sm:$0xf0]  ;;  %v2326_v46 = vor.u32 %v3001_v41, %v2325_v40  ;;  %1302 = vmatpush.bf16.msra.mxu0 %v2070_v44  ;;  %v81_v37 = vld [vmem:[#allocation2] sm:$0xff] }
  0x24   :  { %v2053_v47 = vld [vmem:[#allocation5 + $0x60] sm:$0xf]  ;;  %v2933_v48 = vld [vmem:[#allocation5 + $0x6c] sm:$0xf0]  ;;  %v2454_v50 = vor.u32 %v3033_v43, %v2453_v42  ;;  %1315 = vmatpush.bf16.msra.mxu1 %v2198_v45  ;;  %v295_v41 = vunpack.c.l.b16 %v81_v37 }
  0x25   :  { %v2181_v49 = vld [vmem:[#allocation5 + $0x160] sm:$0xf]  ;;  %v2965_v51 = vld [vmem:[#allocation5 + $0x16c] sm:$0xf0]  ;;  %v2054_v56 = vor.u32 %v2933_v48, %v2053_v47  ;;  %1328 = vmatpush.bf16.msra.mxu2 %v2326_v46  ;;  %v2979_v46 = vld [vmem:[#allocation5 + $0x1e4] sm:$0xf] }
  0x26   :  { %v2309_v52 = vld [vmem:[#allocation5 + $0x260] sm:$0xf]  ;;  %v2997_v53 = vld [vmem:[#allocation5 + $0x26c] sm:$0xf0]  ;;  %v2182_v57 = vor.u32 %v2965_v51, %v2181_v49  ;;  %1341 = vmatpush.bf16.msra.mxu3 %v2454_v50  ;;  %v2247_v47 = vld [vmem:[#allocation5 + $0x1f0] sm:$0xf0]  ;;  %v2122_v49 = vor.u32 %v2947_v34, %v2119_v35 }
  0x27   :  { %v2437_v54 = vld [vmem:[#allocation5 + $0x360] sm:$0xf]  ;;  %v3029_v55 = vld [vmem:[#allocation5 + $0x36c] sm:$0xf0]  ;;  %v2310_v58 = vor.u32 %v2997_v53, %v2309_v52  ;;  %1303 = vmatpush.bf16.msra.mxu0 %v2054_v56  ;;  %v2103_v56 = vld [vmem:[#allocation5 + $0xd0] sm:$0xf0] }
  0x28   :  { %v2037_v59 = vld [vmem:[#allocation5 + $0x40] sm:$0xf]  ;;  %v2929_v60 = vld [vmem:[#allocation5 + $0x4c] sm:$0xf0]  ;;  %v2438_v62 = vor.u32 %v3029_v55, %v2437_v54  ;;  %1316 = vmatpush.bf16.msra.mxu1 %v2182_v57  ;;  %v2943_v55 = vld [vmem:[#allocation5 + $0xc4] sm:$0xf]  ;;  %v3338_v57 = vpack.c.b16 %v295_v41, %v295_v41 }
  0x29   :  { %v2165_v61 = vld [vmem:[#allocation5 + $0x140] sm:$0xf]  ;;  %v2961_v63 = vld [vmem:[#allocation5 + $0x14c] sm:$0xf0]  ;;  %v2038_v4 = vor.u32 %v2929_v60, %v2037_v59  ;;  %1329 = vmatpush.bf16.msra.mxu2 %v2310_v58  ;;  %v296_v58 = vunpack.c.h.b16 %v81_v37  ;;  %v2055_v34 = vld [vmem:[#allocation5 + $0x70] sm:$0xf0] }
  0x2a   :  { %v2293_v0 = vld [vmem:[#allocation5 + $0x240] sm:$0xf]  ;;  %v2993_v1 = vld [vmem:[#allocation5 + $0x24c] sm:$0xf0]  ;;  %v2166_v5 = vor.u32 %v2961_v63, %v2165_v61  ;;  %1342 = vmatpush.bf16.msra.mxu3 %v2438_v62  ;;  %v2250_v61 = vor.u32 %v2979_v46, %v2247_v47  ;;  %v2975_v63 = vld [vmem:[#allocation5 + $0x1c4] sm:$0xf] }
  0x2b   :  { %v2421_v2 = vld [vmem:[#allocation5 + $0x340] sm:$0xf]  ;;  %v3025_v3 = vld [vmem:[#allocation5 + $0x34c] sm:$0xf0]  ;;  %v2294_v6 = vor.u32 %v2993_v1, %v2293_v0  ;;  %1304 = vmatpush.bf16.msra.mxu0 %v2038_v4  ;;  %v2231_v0 = vld [vmem:[#allocation5 + $0x1d0] sm:$0xf0] }
  0x2c   :  { %v2021_v7 = vld [vmem:[#allocation5 + $0x20] sm:$0xf]  ;;  %v2925_v8 = vld [vmem:[#allocation5 + $0x2c] sm:$0xf0]  ;;  %v2422_v10 = vor.u32 %v3025_v3, %v2421_v2  ;;  %1317 = vmatpush.bf16.msra.mxu1 %v2166_v5  ;;  %v2106_v2 = vor.u32 %v2943_v55, %v2103_v56  ;;  %v2927_v46 = vld [vmem:[#allocation5 + $0x44] sm:$0xf] }
  0x2d   :  { %v2149_v9 = vld [vmem:[#allocation5 + $0x120] sm:$0xf]  ;;  %v2957_v11 = vld [vmem:[#allocation5 + $0x12c] sm:$0xf0]  ;;  %v2022_v17 = vor.u32 %v2925_v8, %v2021_v7  ;;  %1330 = vmatpush.bf16.msra.mxu2 %v2294_v6  ;;  %v2939_v7 = vld [vmem:[#allocation5 + $0xa4] sm:$0xf] }
  0x2e   :  { %v2277_v12 = vld [vmem:[#allocation5 + $0x220] sm:$0xf]  ;;  %v2989_v13 = vld [vmem:[#allocation5 + $0x22c] sm:$0xf0]  ;;  %v2150_v21 = vor.u32 %v2957_v11, %v2149_v9  ;;  %1343 = vmatpush.bf16.msra.mxu3 %v2422_v10  ;;  %v2087_v8 = vld [vmem:[#allocation5 + $0xb0] sm:$0xf0]  ;;  %v3344_v9 = vpack.c.b16 %v296_v58, %v296_v58  ;;  %v2234_v10 = vor.u32 %v2975_v63, %v2231_v0 }
  0x2f   :  { %v2405_v14 = vld [vmem:[#allocation5 + $0x320] sm:$0xf]  ;;  %v3021_v15 = vld [vmem:[#allocation5 + $0x32c] sm:$0xf0]  ;;  %v2278_v22 = vor.u32 %v2989_v13, %v2277_v12  ;;  %1305 = vmatpush.bf16.msra.mxu0 %v2022_v17  ;;  %v2971_v12 = vld [vmem:[#allocation5 + $0x1a4] sm:$0xf] }
  0x30   :  { %v2005_v16 = vld [vmem:[#allocation5] sm:$0xf]  ;;  %v2921_v18 = vld [vmem:[#allocation5 + $0xc] sm:$0xf0]  ;;  %v2406_v26 = vor.u32 %v3021_v15, %v2405_v14  ;;  %1318 = vmatpush.bf16.msra.mxu1 %v2150_v21  ;;  %v2215_v13 = vld [vmem:[#allocation5 + $0x1b0] sm:$0xf0]  ;;  %v2090_v15 = vor.u32 %v2939_v7, %v2087_v8 }
  0x31   :  { %v2133_v19 = vld [vmem:[#allocation5 + $0x100] sm:$0xf]  ;;  %v2953_v20 = vld [vmem:[#allocation5 + $0x10c] sm:$0xf0]  ;;  %v2006_v33 = vor.u32 %v2921_v18, %v2005_v16  ;;  %1331 = vmatpush.bf16.msra.mxu2 %v2278_v22  ;;  %v2071_v21 = vld [vmem:[#allocation5 + $0x90] sm:$0xf0] }
  0x32   :  { %v2261_v23 = vld [vmem:[#allocation5 + $0x200] sm:$0xf]  ;;  %v2985_v24 = vld [vmem:[#allocation5 + $0x20c] sm:$0xf0]  ;;  %v2134_v38 = vor.u32 %v2953_v20, %v2133_v19  ;;  %1344 = vmatpush.bf16.msra.mxu3 %v2406_v26  ;;  %v2935_v20 = vld [vmem:[#allocation5 + $0x84] sm:$0xf] }
  0x33   :  { %v82_v25 = vld [vmem:[#allocation2 + $0x8] sm:$0xff]  ;;  %v2389_v27 = vld [vmem:[#allocation5 + $0x300] sm:$0xf]  ;;  %v2262_v39 = vor.u32 %v2985_v24, %v2261_v23  ;;  %1306 = vmatpush.bf16.msra.mxu0 %v2006_v33  ;;  %v84_v22 = vld [vmem:[#allocation2 + $0x18] sm:$0xf]  ;;  %v2218_v23 = vor.u32 %v2971_v12, %v2215_v13 }
  0x34   :  { %v3017_v28 = vld [vmem:[#allocation5 + $0x30c] sm:$0xf0]  ;;  %v2629_v29 = vld [vmem:[#allocation5 + $0x4e0] sm:$0xf]  ;;  %v297_v36 = vunpack.c.l.b16 %v82_v25  ;;  %v298_v42 = vunpack.c.h.b16 %v82_v25  ;;  %1319 = vmatpush.bf16.msra.mxu1 %v2134_v38  ;;  %v2967_v25 = vld [vmem:[#allocation5 + $0x184] sm:$0xf]  ;;  %v301_v35 = vunpack.c.l.b16 %v84_v22 }
  0x35   :  { %v3077_v30 = vld [vmem:[#allocation5 + $0x4ec] sm:$0xf0]  ;;  %v2757_v31 = vld [vmem:[#allocation5 + $0x5e0] sm:$0xf]  ;;  %v2390_v43 = vor.u32 %v3017_v28, %v2389_v27  ;;  %1332 = vmatpush.bf16.msra.mxu2 %v2262_v39  ;;  %v2199_v26 = vld [vmem:[#allocation5 + $0x190] sm:$0xf0]  ;;  %v2074_v28 = vor.u32 %v2935_v20, %v2071_v21 }
  0x36   :  { %v3109_v32 = vld [vmem:[#allocation5 + $0x5ec] sm:$0xf0]  ;;  %v2773_v40 = vld [vmem:[#allocation5 + $0x600] sm:$0xf]  ;;  %v2630_v44 = vor.u32 %v3077_v30, %v2629_v29  ;;  %v3336_v53 = vpack.c.b16 %v297_v36, %v297_v36  ;;  %v3340_v60 = vpack.c.b16 %v298_v42, %v298_v42  ;;  %1307 = vmatmul.bf16.vlgmr.msra.gmra.mxu0 %v3338_v57  ;;  %v2931_v33 = vld [vmem:[#allocation5 + $0x64] sm:$0xf]  ;;  %v2202_v36 = vor.u32 %v2967_v25, %v2199_v26 }
  0x37   :  { %v3113_v45 = vld [vmem:[#allocation5 + $0x60c] sm:$0xf0]  ;;  %v2758_v48 = vor.u32 %v3109_v32, %v2757_v31  ;;  %v2613_v50 = vld [vmem:[#allocation5 + $0x4c0] sm:$0xf]  ;;  %1345 = vmatpush.bf16.msra.mxu3 %v2390_v43  ;;  %1320 = vmatmul.bf16.vlgmr.msra.gmra.mxu1 %v3344_v9  ;;  %v2963_v38 = vld [vmem:[#allocation5 + $0x164] sm:$0xf]  ;;  %v2058_v41 = vor.u32 %v2931_v33, %v2055_v34 }
  0x38   :  { %v3073_v51 = vld [vmem:[#allocation5 + $0x4cc] sm:$0xf0]  ;;  %v2741_v52 = vld [vmem:[#allocation5 + $0x5c0] sm:$0xf]  ;;  %v2774_v59 = vor.u32 %v3113_v45, %v2773_v40  ;;  %1351 = vmatpush.bf16.msrb.mxu0 %v2630_v44  ;;  %1333 = vmatmul.bf16.vlgmr.msra.gmra.mxu2 %v3336_v53  ;;  %v2183_v39 = vld [vmem:[#allocation5 + $0x170] sm:$0xf0] }
  0x39   :  { %v3105_v54 = vld [vmem:[#allocation5 + $0x5cc] sm:$0xf0]  ;;  %v2614_v62 = vor.u32 %v3073_v51, %v2613_v50  ;;  %1364 = vmatpush.bf16.msrb.mxu1 %v2758_v48  ;;  %v2597_v3 = vld [vmem:[#allocation5 + $0x4a0] sm:$0xf]  ;;  %v2039_v47 = vld [vmem:[#allocation5 + $0x50] sm:$0xf0]  ;;  %v3348_v48 = vpack.c.b16 %v301_v35, %v301_v35 }
  0x3a   :  { %v2742_v1 = vor.u32 %v3105_v54, %v2741_v52  ;;  %v3069_v4 = vld [vmem:[#allocation5 + $0x4ac] sm:$0xf0]  ;;  %v2725_v5 = vld [vmem:[#allocation5 + $0x5a0] sm:$0xf]  ;;  %1384 = vmatpush.bf16.msrb.mxu2 %v2774_v59  ;;  %1346 = vmatmul.bf16.vlgmr.msra.gmra.mxu3 %v3340_v60  ;;  %v2959_v51 = vld [vmem:[#allocation5 + $0x144] sm:$0xf]  ;;  %v2042_v55 = vor.u32 %v2927_v46, %v2039_v47 }
  0x3b   :  { %1390 = vmatpush.bf16.msrb.mxu3 %v2122_v49  ;;  %v3101_v6 = vld [vmem:[#allocation5 + $0x5ac] sm:$0xf0]  ;;  %v2598_v11 = vor.u32 %v3069_v4, %v2597_v3  ;;  %v2581_v16 = vld [vmem:[#allocation5 + $0x480] sm:$0xf]  ;;  %v2186_v49 = vor.u32 %v2963_v38, %v2183_v39  ;;  %v2167_v52 = vld [vmem:[#allocation5 + $0x150] sm:$0xf0] }
  0x3c   :  { %1352 = vmatpush.bf16.msrb.mxu0 %v2614_v62  ;;  %v2726_v14 = vor.u32 %v3101_v6, %v2725_v5  ;;  %v3065_v17 = vld [vmem:[#allocation5 + $0x48c] sm:$0xf0]  ;;  %v2709_v18 = vld [vmem:[#allocation5 + $0x580] sm:$0xf]  ;;  %v2923_v62 = vld [vmem:[#allocation5 + $0x24] sm:$0xf] }
  0x3d   :  { %1365 = vmatpush.bf16.msrb.mxu1 %v2742_v1  ;;  %v3097_v19 = vld [vmem:[#allocation5 + $0x58c] sm:$0xf0]  ;;  %v2582_v24 = vor.u32 %v3065_v17, %v2581_v16  ;;  %v2565_v29 = vld [vmem:[#allocation5 + $0x460] sm:$0xf]  ;;  %v2023_v63 = vld [vmem:[#allocation5 + $0x30] sm:$0xf0]  ;;  %v2170_v1 = vor.u32 %v2959_v51, %v2167_v52 }
  0x3e   :  { %1403 = vmatpush.bf16.msra.mxu2 %v2250_v61  ;;  %v2710_v27 = vor.u32 %v3097_v19, %v2709_v18  ;;  %v3061_v30 = vld [vmem:[#allocation5 + $0x46c] sm:$0xf0]  ;;  %v2693_v31 = vld [vmem:[#allocation5 + $0x560] sm:$0xf]  ;;  %v2955_v0 = vld [vmem:[#allocation5 + $0x124] sm:$0xf]  ;;  %v2026_v7 = vor.u32 %v2923_v62, %v2023_v63 }
  0x3f   :  { %1391 = vmatpush.bf16.msrb.mxu3 %v2106_v2  ;;  %v3093_v32 = vld [vmem:[#allocation5 + $0x56c] sm:$0xf0]  ;;  %v2566_v37 = vor.u32 %v3061_v30, %v2565_v29  ;;  %v2549_v42 = vld [vmem:[#allocation5 + $0x440] sm:$0xf]  ;;  %v2151_v3 = vld [vmem:[#allocation5 + $0x130] sm:$0xf0] }
  0x40   :  { %1353 = vmatpush.bf16.msrb.mxu0 %v2598_v11  ;;  %v2694_v40 = vor.u32 %v3093_v32, %v2693_v31  ;;  %v3057_v43 = vld [vmem:[#allocation5 + $0x44c] sm:$0xf0]  ;;  %v2677_v44 = vld [vmem:[#allocation5 + $0x540] sm:$0xf]  ;;  %v83_v5 = vld [vmem:[#allocation2 + $0x10] sm:$0xff]  ;;  %v2154_v19 = vor.u32 %v2955_v0, %v2151_v3 }
  0x41   :  { %1366 = vmatpush.bf16.msrb.mxu1 %v2726_v14  ;;  %v3089_v45 = vld [vmem:[#allocation5 + $0x54c] sm:$0xf0]  ;;  %v2550_v50 = vor.u32 %v3057_v43, %v2549_v42  ;;  %v2533_v56 = vld [vmem:[#allocation5 + $0x420] sm:$0xf]  ;;  %v2919_v12 = vld [vmem:[#allocation5 + $0x4] sm:$0xf]  ;;  %v299_v18 = vunpack.c.l.b16 %v83_v5 }
  0x42   :  { %1404 = vmatpush.bf16.msra.mxu2 %v2234_v10  ;;  %v2678_v54 = vor.u32 %v3089_v45, %v2677_v44  ;;  %v3053_v58 = vld [vmem:[#allocation5 + $0x42c] sm:$0xf0]  ;;  %v2661_v59 = vld [vmem:[#allocation5 + $0x520] sm:$0xf]  ;;  %v2007_v13 = vld [vmem:[#allocation5 + $0x10] sm:$0xf0] }
  0x43   :  { %1392 = vmatpush.bf16.msrb.mxu3 %v2090_v15  ;;  %v3085_v61 = vld [vmem:[#allocation5 + $0x52c] sm:$0xf0]  ;;  %v2534_v2 = vor.u32 %v3053_v58, %v2533_v56  ;;  %v2517_v4 = vld [vmem:[#allocation5 + $0x400] sm:$0xf]  ;;  %v3011_v14 = vld [vmem:[#allocation5 + $0x2e4] sm:$0xf]  ;;  %v2010_v25 = vor.u32 %v2919_v12, %v2007_v13  ;;  %v3352_v34 = vpack.c.b16 %v299_v18, %v299_v18 }
  0x44   :  { %1354 = vmatpush.bf16.msrb.mxu0 %v2582_v24  ;;  %v2662_v6 = vor.u32 %v3085_v61, %v2661_v59  ;;  %v3049_v8 = vld [vmem:[#allocation5 + $0x40c] sm:$0xf0]  ;;  %v2645_v10 = vld [vmem:[#allocation5 + $0x500] sm:$0xf]  ;;  %v2375_v15 = vld [vmem:[#allocation5 + $0x2f0] sm:$0xf0] }
  0x45   :  { %1367 = vmatpush.bf16.msrb.mxu1 %v2710_v27  ;;  %v3081_v11 = vld [vmem:[#allocation5 + $0x50c] sm:$0xf0]  ;;  %v3043_v16 = vld [vmem:[#allocation5 + $0x3e4] sm:$0xf]  ;;  %v2503_v17 = vld [vmem:[#allocation5 + $0x3f0] sm:$0xf0]  ;;  %v2518_v20 = vor.u32 %v3049_v8, %v2517_v4 }
  0x46   :  { %1405 = vmatpush.bf16.msra.mxu2 %v2218_v23  ;;  %v3075_v21 = vld [vmem:[#allocation5 + $0x4e4] sm:$0xf]  ;;  %v2631_v22 = vld [vmem:[#allocation5 + $0x4f0] sm:$0xf0]  ;;  %v300_v23 = vunpack.c.h.b16 %v83_v5  ;;  %v2646_v24 = vor.u32 %v3081_v11, %v2645_v10  ;;  %v2506_v29 = vor.u32 %v3043_v16, %v2503_v17 }
  0x47   :  { %1393 = vmatpush.bf16.msrb.mxu3 %v2074_v28  ;;  %v2951_v26 = vld [vmem:[#allocation5 + $0x104] sm:$0xf]  ;;  %v2135_v27 = vld [vmem:[#allocation5 + $0x110] sm:$0xf0]  ;;  %v2378_v28 = vor.u32 %v3011_v14, %v2375_v15  ;;  %v2634_v33 = vor.u32 %v3075_v21, %v2631_v22 }
  0x48   :  { %1355 = vmatpush.bf16.msrb.mxu0 %v2566_v37  ;;  %2787 = vmatmul.msk.bf16.vlgmr.msrb.gmra.mxu2 %vm1295_vm0, %v3348_v48  ;;  %v3107_v30 = vld [vmem:[#allocation5 + $0x5e4] sm:$0xf]  ;;  %v2759_v31 = vld [vmem:[#allocation5 + $0x5f0] sm:$0xf0]  ;;  %v2138_v38 = vor.u32 %v2951_v26, %v2135_v27  ;;  %v3354_v39 = vpack.c.b16 %v300_v23, %v300_v23 }
  0x49   :  { %1368 = vmatpush.bf16.msrb.mxu1 %v2694_v40  ;;  %v3007_v32 = vld [vmem:[#allocation5 + $0x2c4] sm:$0xf]  ;;  %v2359_v35 = vld [vmem:[#allocation5 + $0x2d0] sm:$0xf0]  ;;  %v2762_v42 = vor.u32 %v3107_v30, %v2759_v31 }
  0x4a   :  { %1406 = vmatpush.bf16.msra.mxu2 %v2202_v36  ;;  %v3039_v36 = vld [vmem:[#allocation5 + $0x3c4] sm:$0xf]  ;;  %v2487_v37 = vld [vmem:[#allocation5 + $0x3d0] sm:$0xf0]  ;;  %v2362_v43 = vor.u32 %v3007_v32, %v2359_v35 }
  0x4b   :  { %1394 = vmatpush.bf16.msrb.mxu3 %v2058_v41  ;;  %v3071_v40 = vld [vmem:[#allocation5 + $0x4c4] sm:$0xf]  ;;  %v2615_v41 = vld [vmem:[#allocation5 + $0x4d0] sm:$0xf0]  ;;  %v2490_v44 = vor.u32 %v3039_v36, %v2487_v37 }
  0x4c   :  { %1356 = vmatpush.bf16.msrb.mxu0 %v2550_v50  ;;  %v3103_v45 = vld [vmem:[#allocation5 + $0x5c4] sm:$0xf]  ;;  %v2743_v46 = vld [vmem:[#allocation5 + $0x5d0] sm:$0xf0] }
  0x4d   :  { %1369 = vmatpush.bf16.msrb.mxu1 %v2678_v54  ;;  %v3003_v47 = vld [vmem:[#allocation5 + $0x2a4] sm:$0xf]  ;;  %v2343_v50 = vld [vmem:[#allocation5 + $0x2b0] sm:$0xf0]  ;;  %v2746_v56 = vor.u32 %v3103_v45, %v2743_v46 }
  0x4e   :  { %1407 = vmatpush.bf16.msra.mxu2 %v2186_v49  ;;  %v2618_v49 = vor.u32 %v3071_v40, %v2615_v41  ;;  %v3035_v51 = vld [vmem:[#allocation5 + $0x3a4] sm:$0xf]  ;;  %v2471_v52 = vld [vmem:[#allocation5 + $0x3b0] sm:$0xf0]  ;;  %v2346_v58 = vor.u32 %v3003_v47, %v2343_v50 }
  0x4f   :  { %1395 = vmatpush.bf16.msrb.mxu3 %v2042_v55  ;;  %v3067_v54 = vld [vmem:[#allocation5 + $0x4a4] sm:$0xf]  ;;  %v2599_v55 = vld [vmem:[#allocation5 + $0x4b0] sm:$0xf0]  ;;  %v2474_v59 = vor.u32 %v3035_v51, %v2471_v52 }
  0x50   :  { %1357 = vmatpush.bf16.msrb.mxu0 %v2534_v2  ;;  %v3099_v61 = vld [vmem:[#allocation5 + $0x5a4] sm:$0xf]  ;;  %v2727_v62 = vld [vmem:[#allocation5 + $0x5b0] sm:$0xf0]  ;;  %v2602_v0 = vor.u32 %v3067_v54, %v2599_v55 }
  0x51   :  { %1370 = vmatpush.bf16.msrb.mxu1 %v2662_v6  ;;  %v2999_v63 = vld [vmem:[#allocation5 + $0x284] sm:$0xf]  ;;  %v2455_v3 = vld [vmem:[#allocation5 + $0x390] sm:$0xf0]  ;;  %v2730_v6 = vor.u32 %v3099_v61, %v2727_v62  ;;  %v2125_v61 = vld [vmem:[#allocation5 + $0xe8] sm:$0xf] }
  0x52   :  { %1408 = vmatpush.bf16.msra.mxu2 %v2170_v1  ;;  %v2327_v1 = vld [vmem:[#allocation5 + $0x290] sm:$0xf0]  ;;  %v3031_v2 = vld [vmem:[#allocation5 + $0x384] sm:$0xf]  ;;  %v2950_v62 = vld [vmem:[#allocation5 + $0xf4] sm:$0xf0] }
  0x53   :  { %1396 = vmatpush.bf16.msrb.mxu3 %v2026_v7  ;;  %v3063_v4 = vld [vmem:[#allocation5 + $0x484] sm:$0xf]  ;;  %v2583_v5 = vld [vmem:[#allocation5 + $0x490] sm:$0xf0]  ;;  %v2330_v7 = vor.u32 %v2999_v63, %v2327_v1  ;;  %v2458_v8 = vor.u32 %v3031_v2, %v2455_v3  ;;  %v2381_v2 = vld [vmem:[#allocation5 + $0x2e8] sm:$0xf] }
  0x54   :  { %1358 = vmatpush.bf16.msrb.mxu0 %v2518_v20  ;;  %v3095_v10 = vld [vmem:[#allocation5 + $0x584] sm:$0xf]  ;;  %v2711_v11 = vld [vmem:[#allocation5 + $0x590] sm:$0xf0]  ;;  %v2586_v13 = vor.u32 %v3063_v4, %v2583_v5  ;;  %v3014_v3 = vld [vmem:[#allocation5 + $0x2f4] sm:$0xf0] }
  0x55   :  { %1371 = vmatpush.bf16.msrb.mxu1 %v2646_v24  ;;  %v2995_v12 = vld [vmem:[#allocation5 + $0x264] sm:$0xf]  ;;  %v2311_v14 = vld [vmem:[#allocation5 + $0x270] sm:$0xf0] }
  0x56   :  { %1409 = vmatpush.bf16.msra.mxu2 %v2154_v19  ;;  %v3027_v15 = vld [vmem:[#allocation5 + $0x364] sm:$0xf]  ;;  %v2439_v16 = vld [vmem:[#allocation5 + $0x370] sm:$0xf0]  ;;  %v2714_v19 = vor.u32 %v3095_v10, %v2711_v11  ;;  %v2314_v20 = vor.u32 %v2995_v12, %v2311_v14  ;;  %v2126_v10 = vor.u32 %v2950_v62, %v2125_v61  ;;  %v2509_v11 = vld [vmem:[#allocation5 + $0x3e8] sm:$0xf] }
  0x57   :  { %1397 = vmatpush.bf16.msrb.mxu3 %v2010_v25  ;;  %1359 = vmatmul.bf16.vlgmr.msrb.gmra.mxu0 %v3352_v34  ;;  %v3059_v17 = vld [vmem:[#allocation5 + $0x464] sm:$0xf]  ;;  %v2567_v18 = vld [vmem:[#allocation5 + $0x470] sm:$0xf0]  ;;  %v2442_v21 = vor.u32 %v3027_v15, %v2439_v16  ;;  %v3046_v12 = vld [vmem:[#allocation5 + $0x3f4] sm:$0xf0]  ;;  %v2382_v16 = vor.u32 %v3014_v3, %v2381_v2 }
  0x58   :  { %1416 = vmatpush.bf16.msra.mxu0 %v2378_v28  ;;  %1372 = vmatmul.bf16.vlgmr.msrb.gmra.mxu1 %v3354_v39  ;;  %v3091_v22 = vld [vmem:[#allocation5 + $0x564] sm:$0xf]  ;;  %v2695_v23 = vld [vmem:[#allocation5 + $0x570] sm:$0xf0]  ;;  %v2570_v25 = vor.u32 %v3059_v17, %v2567_v18  ;;  %v2253_v14 = vld [vmem:[#allocation5 + $0x1e8] sm:$0xf] }
  0x59   :  { %1429 = vmatpush.bf16.msra.mxu1 %v2506_v29  ;;  %v2991_v24 = vld [vmem:[#allocation5 + $0x244] sm:$0xf]  ;;  %v2295_v26 = vld [vmem:[#allocation5 + $0x250] sm:$0xf0]  ;;  %v2698_v31 = vor.u32 %v3091_v22, %v2695_v23  ;;  %v2982_v15 = vld [vmem:[#allocation5 + $0x1f4] sm:$0xf0] }
  0x5a   :  { %1410 = vmatpush.bf16.msra.mxu2 %v2138_v38  ;;  %1398 = vmatmul.bf16.vlgmr.msrb.gmra.mxu3 %v3338_v57  ;;  %v3023_v27 = vld [vmem:[#allocation5 + $0x344] sm:$0xf]  ;;  %v2423_v28 = vld [vmem:[#allocation5 + $0x350] sm:$0xf0]  ;;  %v2109_v18 = vld [vmem:[#allocation5 + $0xc8] sm:$0xf]  ;;  %v2254_v23 = vor.u32 %v2982_v15, %v2253_v14 }
  0x5b   :  { %1442 = vmatpush.bf16.msra.mxu3 %v2634_v33  ;;  %v3055_v29 = vld [vmem:[#allocation5 + $0x444] sm:$0xf]  ;;  %v2551_v30 = vld [vmem:[#allocation5 + $0x450] sm:$0xf0]  ;;  %v2298_v33 = vor.u32 %v2991_v24, %v2295_v26  ;;  %v2426_v35 = vor.u32 %v3023_v27, %v2423_v28  ;;  %v3010_v22 = vld [vmem:[#allocation5 + $0x2d4] sm:$0xf0] }
  0x5c   :  { %1417 = vmatpush.bf16.msra.mxu0 %v2362_v43  ;;  %v3087_v32 = vld [vmem:[#allocation5 + $0x544] sm:$0xf]  ;;  %v2679_v36 = vld [vmem:[#allocation5 + $0x550] sm:$0xf0]  ;;  %v2554_v40 = vor.u32 %v3055_v29, %v2551_v30  ;;  %v2493_v24 = vld [vmem:[#allocation5 + $0x3c8] sm:$0xf] }
  0x5d   :  { %1430 = vmatpush.bf16.msra.mxu1 %v2490_v44  ;;  %1411 = vmatmul.bf16.vlgmr.msra.gmra.mxu2 %v3344_v9  ;;  %v2987_v37 = vld [vmem:[#allocation5 + $0x224] sm:$0xf]  ;;  %v2279_v38 = vld [vmem:[#allocation5 + $0x230] sm:$0xf0]  ;;  %v2682_v45 = vor.u32 %v3087_v32, %v2679_v36  ;;  %v2237_v27 = vld [vmem:[#allocation5 + $0x1c8] sm:$0xf] }
  0x5e   :  { %1455 = vmatpush.bf16.msrb.mxu2 %v2762_v42  ;;  %v3019_v41 = vld [vmem:[#allocation5 + $0x324] sm:$0xf]  ;;  %v2407_v42 = vld [vmem:[#allocation5 + $0x330] sm:$0xf0]  ;;  %v2978_v28 = vld [vmem:[#allocation5 + $0x1d4] sm:$0xf0] }
  0x5f   :  { %1443 = vmatpush.bf16.msra.mxu3 %v2618_v49  ;;  %v3051_v43 = vld [vmem:[#allocation5 + $0x424] sm:$0xf]  ;;  %v2535_v44 = vld [vmem:[#allocation5 + $0x430] sm:$0xf0]  ;;  %v2282_v49 = vor.u32 %v2987_v37, %v2279_v38  ;;  %v2410_v50 = vor.u32 %v3019_v41, %v2407_v42  ;;  %v2093_v30 = vld [vmem:[#allocation5 + $0xa8] sm:$0xf]  ;;  %v2238_v36 = vor.u32 %v2978_v28, %v2237_v27 }
  0x60   :  { %1418 = vmatpush.bf16.msra.mxu0 %v2346_v58  ;;  %v3083_v46 = vld [vmem:[#allocation5 + $0x524] sm:$0xf]  ;;  %v2663_v47 = vld [vmem:[#allocation5 + $0x530] sm:$0xf0]  ;;  %v2538_v55 = vor.u32 %v3051_v43, %v2535_v44  ;;  %v2477_v37 = vld [vmem:[#allocation5 + $0x3a8] sm:$0xf] }
  0x61   :  { %1431 = vmatpush.bf16.msra.mxu1 %v2474_v59  ;;  %v2983_v51 = vld [vmem:[#allocation5 + $0x204] sm:$0xf]  ;;  %v2263_v52 = vld [vmem:[#allocation5 + $0x210] sm:$0xf0]  ;;  %v3038_v38 = vld [vmem:[#allocation5 + $0x3b4] sm:$0xf0] }
  0x62   :  { %1456 = vmatpush.bf16.msrb.mxu2 %v2746_v56  ;;  %v3015_v54 = vld [vmem:[#allocation5 + $0x304] sm:$0xf]  ;;  %v2391_v56 = vld [vmem:[#allocation5 + $0x310] sm:$0xf0]  ;;  %v2266_v4 = vor.u32 %v2983_v51, %v2263_v52  ;;  %v2221_v41 = vld [vmem:[#allocation5 + $0x1a8] sm:$0xf] }
  0x63   :  { %1444 = vmatpush.bf16.msra.mxu3 %v2602_v0  ;;  %v3047_v58 = vld [vmem:[#allocation5 + $0x404] sm:$0xf]  ;;  %v2519_v59 = vld [vmem:[#allocation5 + $0x410] sm:$0xf0]  ;;  %v2666_v0 = vor.u32 %v3083_v46, %v2663_v47  ;;  %v2394_v5 = vor.u32 %v3015_v54, %v2391_v56  ;;  %v2974_v42 = vld [vmem:[#allocation5 + $0x1b4] sm:$0xf0]  ;;  %v2478_v46 = vor.u32 %v3038_v38, %v2477_v37 }
  0x64   :  { %1419 = vmatpush.bf16.msra.mxu0 %v2330_v7  ;;  %v3111_v63 = vld [vmem:[#allocation5 + $0x604] sm:$0xf]  ;;  %v2775_v1 = vld [vmem:[#allocation5 + $0x610] sm:$0xf0]  ;;  %v2077_v44 = vld [vmem:[#allocation5 + $0x88] sm:$0xf] }
  0x65   :  { %1432 = vmatpush.bf16.msra.mxu1 %v2458_v8  ;;  %v2647_v7 = vld [vmem:[#allocation5 + $0x510] sm:$0xf0]  ;;  %v2522_v8 = vor.u32 %v3047_v58, %v2519_v59  ;;  %v2333_v47 = vld [vmem:[#allocation5 + $0x288] sm:$0xf]  ;;  %v3034_v52 = vld [vmem:[#allocation5 + $0x394] sm:$0xf0] }
  0x66   :  { %1457 = vmatpush.bf16.msrb.mxu2 %v2730_v6  ;;  %v3079_v6 = vld [vmem:[#allocation5 + $0x504] sm:$0xf]  ;;  %v2461_v51 = vld [vmem:[#allocation5 + $0x388] sm:$0xf]  ;;  %v2970_v56 = vld [vmem:[#allocation5 + $0x194] sm:$0xf0] }
  0x67   :  { %1445 = vmatpush.bf16.msra.mxu3 %v2586_v13  ;;  %v2778_v13 = vor.u32 %v3111_v63, %v2775_v1  ;;  %v2650_v17 = vor.u32 %v3079_v6, %v2647_v7  ;;  %v2061_v59 = vld [vmem:[#allocation5 + $0x68] sm:$0xf]  ;;  %v2934_v61 = vld [vmem:[#allocation5 + $0x74] sm:$0xf0]  ;;  %v2462_v62 = vor.u32 %v3034_v52, %v2461_v51  ;;  %v2948_v51 = vld [vmem:[#allocation5 + $0xec] sm:$0xf] }
  0x68   :  { %1420 = vmatpush.bf16.msra.mxu0 %v2314_v20  ;;  %v2510_v20 = vor.u32 %v3046_v12, %v2509_v11  ;;  %v2317_v63 = vld [vmem:[#allocation5 + $0x268] sm:$0xf]  ;;  %v3030_v3 = vld [vmem:[#allocation5 + $0x374] sm:$0xf0]  ;;  %v2127_v52 = vld [vmem:[#allocation5 + $0xf8] sm:$0xf0] }
  0x69   :  { %1433 = vmatpush.bf16.msra.mxu1 %v2442_v21  ;;  %v2365_v21 = vld [vmem:[#allocation5 + $0x2c8] sm:$0xf]  ;;  %v2966_v6 = vld [vmem:[#allocation5 + $0x174] sm:$0xf0] }
  0x6a   :  { %1458 = vmatpush.bf16.msrb.mxu2 %v2714_v19  ;;  %v2946_v19 = vld [vmem:[#allocation5 + $0xd4] sm:$0xf0]  ;;  %v2366_v29 = vor.u32 %v3010_v22, %v2365_v21  ;;  %v2445_v2 = vld [vmem:[#allocation5 + $0x368] sm:$0xf] }
  0x6b   :  { %1446 = vmatpush.bf16.msra.mxu3 %v2570_v25  ;;  %v3042_v25 = vld [vmem:[#allocation5 + $0x3d4] sm:$0xf0]  ;;  %v2110_v26 = vor.u32 %v2946_v19, %v2109_v18  ;;  %v2446_v11 = vor.u32 %v3030_v3, %v2445_v2  ;;  %v2301_v12 = vld [vmem:[#allocation5 + $0x248] sm:$0xf]  ;;  %v2130_v3 = vor.u32 %v2948_v51, %v2127_v52 }
  0x6c   :  { %1421 = vmatpush.bf16.msra.mxu0 %v2298_v33  ;;  %v2494_v32 = vor.u32 %v3042_v25, %v2493_v24  ;;  %v2349_v33 = vld [vmem:[#allocation5 + $0x2a8] sm:$0xf]  ;;  %v2962_v19 = vld [vmem:[#allocation5 + $0x154] sm:$0xf0] }
  0x6d   :  { %1434 = vmatpush.bf16.msra.mxu1 %v2426_v35  ;;  %v3006_v35 = vld [vmem:[#allocation5 + $0x2b4] sm:$0xf0]  ;;  %v2429_v15 = vld [vmem:[#allocation5 + $0x348] sm:$0xf] }
  0x6e   :  { %1459 = vmatpush.bf16.msrb.mxu2 %v2698_v31  ;;  %v2942_v31 = vld [vmem:[#allocation5 + $0xb4] sm:$0xf0]  ;;  %v2350_v43 = vor.u32 %v3006_v35, %v2349_v33  ;;  %v2173_v18 = vld [vmem:[#allocation5 + $0x148] sm:$0xf] }
  0x6f   :  { %1447 = vmatpush.bf16.msra.mxu3 %v2554_v40  ;;  %v2094_v40 = vor.u32 %v2942_v31, %v2093_v30  ;;  %v2029_v21 = vld [vmem:[#allocation5 + $0x28] sm:$0xf]  ;;  %v2926_v22 = vld [vmem:[#allocation5 + $0x34] sm:$0xf0] }
  0x70   :  { %1422 = vmatpush.bf16.msra.mxu0 %v2282_v49  ;;  %v3002_v49 = vld [vmem:[#allocation5 + $0x294] sm:$0xf0]  ;;  %v2285_v24 = vld [vmem:[#allocation5 + $0x228] sm:$0xf] }
  0x71   :  { %1435 = vmatpush.bf16.msra.mxu1 %v2410_v50  ;;  %v2222_v50 = vor.u32 %v2974_v42, %v2221_v41  ;;  %v2334_v58 = vor.u32 %v3002_v49, %v2333_v47  ;;  %v2990_v25 = vld [vmem:[#allocation5 + $0x234] sm:$0xf0]  ;;  %v2413_v27 = vld [vmem:[#allocation5 + $0x328] sm:$0xf] }
  0x72   :  { %1460 = vmatpush.bf16.msrb.mxu2 %v2682_v45  ;;  %v2938_v45 = vld [vmem:[#allocation5 + $0x94] sm:$0xf0]  ;;  %v2157_v30 = vld [vmem:[#allocation5 + $0x128] sm:$0xf]  ;;  %v2286_v33 = vor.u32 %v2990_v25, %v2285_v24 }
  0x73   :  { %1448 = vmatpush.bf16.msra.mxu3 %v2538_v55  ;;  %v2078_v54 = vor.u32 %v2938_v45, %v2077_v44  ;;  %v2205_v55 = vld [vmem:[#allocation5 + $0x188] sm:$0xf]  ;;  %v3022_v28 = vld [vmem:[#allocation5 + $0x334] sm:$0xf0] }
  0x74   :  { %1423 = vmatpush.bf16.msra.mxu0 %v2266_v4  ;;  %v2206_v1 = vor.u32 %v2970_v56, %v2205_v55  ;;  %v2062_v4 = vor.u32 %v2934_v61, %v2061_v59  ;;  %v2958_v31 = vld [vmem:[#allocation5 + $0x134] sm:$0xf0]  ;;  %v2414_v38 = vor.u32 %v3022_v28, %v2413_v27  ;;  %v2269_v41 = vld [vmem:[#allocation5 + $0x208] sm:$0xf]  ;;  %v2223_v27 = vld [vmem:[#allocation5 + $0x1b8] sm:$0xf0] }
  0x75   :  { %1436 = vmatpush.bf16.msra.mxu1 %v2394_v5  ;;  %v2189_v5 = vld [vmem:[#allocation5 + $0x168] sm:$0xf]  ;;  %v2922_v35 = vld [vmem:[#allocation5 + $0x14] sm:$0xf0]  ;;  %v2158_v44 = vor.u32 %v2958_v31, %v2157_v30  ;;  %v2936_v30 = vld [vmem:[#allocation5 + $0x8c] sm:$0xf] }
  0x76   :  { %1461 = vmatpush.bf16.msrb.mxu2 %v2666_v0  ;;  %v2998_v0 = vld [vmem:[#allocation5 + $0x274] sm:$0xf0]  ;;  %v2190_v14 = vor.u32 %v2966_v6, %v2189_v5  ;;  %v2765_v56 = vld [vmem:[#allocation5 + $0x5e8] sm:$0xf]  ;;  %v2944_v5 = vld [vmem:[#allocation5 + $0xcc] sm:$0xf] }
  0x77   :  { %1449 = vmatpush.bf16.msra.mxu3 %v2522_v8  ;;  %1424 = vmatmul.bf16.vlgmr.msra.gmra.mxu0 %v3336_v53  ;;  %v2318_v7 = vor.u32 %v2998_v0, %v2317_v63  ;;  %v2045_v8 = vld [vmem:[#allocation5 + $0x48] sm:$0xf]  ;;  %v3078_v37 = vld [vmem:[#allocation5 + $0x4f4] sm:$0xf0]  ;;  %v2980_v0 = vld [vmem:[#allocation5 + $0x1ec] sm:$0xf] }
  0x78   :  { %1507 = vmatpush.bf16.msrb.mxu0 %v2382_v16  ;;  %1437 = vmatmul.bf16.vlgmr.msra.gmra.mxu1 %v3340_v60  ;;  %v3026_v16 = vld [vmem:[#allocation5 + $0x354] sm:$0xf0]  ;;  %v2621_v59 = vld [vmem:[#allocation5 + $0x4c8] sm:$0xf]  ;;  %v2111_v6 = vld [vmem:[#allocation5 + $0xd8] sm:$0xf0] }
  0x79   :  { %1481 = vmatpush.bf16.msrb.mxu1 %v2126_v10  ;;  %v2930_v10 = vld [vmem:[#allocation5 + $0x54] sm:$0xf0]  ;;  %v2589_v24 = vld [vmem:[#allocation5 + $0x488] sm:$0xf]  ;;  %v2079_v31 = vld [vmem:[#allocation5 + $0x98] sm:$0xf0] }
  0x7a   :  { %1462 = vmatpush.bf16.msrb.mxu2 %v2650_v17  ;;  %1450 = vmatmul.bf16.vlgmr.msra.gmra.mxu3 %v3352_v34  ;;  %v2046_v17 = vor.u32 %v2930_v10, %v2045_v8  ;;  %v2986_v42 = vld [vmem:[#allocation5 + $0x214] sm:$0xf0]  ;;  %v2749_v10 = vld [vmem:[#allocation5 + $0x5c8] sm:$0xf] }
  0x7b   :  { %1475 = vmatpush.bf16.msrb.mxu3 %v2778_v13  ;;  %v2994_v13 = vld [vmem:[#allocation5 + $0x254] sm:$0xf0]  ;;  %v2270_v55 = vor.u32 %v2986_v42, %v2269_v41  ;;  %v2207_v41 = vld [vmem:[#allocation5 + $0x198] sm:$0xf0]  ;;  %v2082_v42 = vor.u32 %v2936_v30, %v2079_v31  ;;  %v2557_v51 = vld [vmem:[#allocation5 + $0x448] sm:$0xf] }
  0x7c   :  { %1508 = vmatpush.bf16.msrb.mxu0 %v2366_v29  ;;  %v2030_v29 = vor.u32 %v2926_v22, %v2029_v21  ;;  %v3018_v45 = vld [vmem:[#allocation5 + $0x314] sm:$0xf0]  ;;  %v2733_v22 = vld [vmem:[#allocation5 + $0x5a8] sm:$0xf]  ;;  %v2511_v30 = vld [vmem:[#allocation5 + $0x3f8] sm:$0xf0] }
  0x7d   :  { %1482 = vmatpush.bf16.msrb.mxu1 %v2110_v26  ;;  %1463 = vmatmul.bf16.vlgmr.msrb.gmra.mxu2 %v3354_v39  ;;  %v2174_v26 = vor.u32 %v2962_v19, %v2173_v18  ;;  %v3114_v47 = vld [vmem:[#allocation5 + $0x614] sm:$0xf0]  ;;  %v2940_v18 = vld [vmem:[#allocation5 + $0xac] sm:$0xf]  ;;  %v2095_v19 = vld [vmem:[#allocation5 + $0xb8] sm:$0xf0] }
  0x7e   :  { %1520 = vmatpush.bf16.msra.mxu2 %v2510_v20  ;;  %v2302_v20 = vor.u32 %v2994_v13, %v2301_v12  ;;  %v2605_v12 = vld [vmem:[#allocation5 + $0x4a8] sm:$0xf]  ;;  %v3070_v13 = vld [vmem:[#allocation5 + $0x4b4] sm:$0xf0]  ;;  %v2098_v28 = vor.u32 %v2940_v18, %v2095_v19  ;;  %v2159_v18 = vld [vmem:[#allocation5 + $0x138] sm:$0xf0] }
  0x7f   :  { %1494 = vmatpush.bf16.msra.mxu3 %v2254_v23  ;;  %v2430_v23 = vor.u32 %v3026_v16, %v2429_v15  ;;  %v2239_v15 = vld [vmem:[#allocation5 + $0x1d8] sm:$0xf0]  ;;  %v2114_v16 = vor.u32 %v2944_v5, %v2111_v6  ;;  %v3066_v25 = vld [vmem:[#allocation5 + $0x494] sm:$0xf0] }
  0x80   :  { %1509 = vmatpush.bf16.msrb.mxu0 %v2350_v43  ;;  %v2397_v43 = vld [vmem:[#allocation5 + $0x308] sm:$0xf]  ;;  %v3058_v52 = vld [vmem:[#allocation5 + $0x454] sm:$0xf0]  ;;  %v2175_v5 = vld [vmem:[#allocation5 + $0x158] sm:$0xf0] }
  0x81   :  { %1483 = vmatpush.bf16.msrb.mxu1 %v2094_v40  ;;  %v2141_v40 = vld [vmem:[#allocation5 + $0x108] sm:$0xf]  ;;  %v2398_v61 = vor.u32 %v3018_v45, %v2397_v43  ;;  %v2063_v45 = vld [vmem:[#allocation5 + $0x78] sm:$0xf0] }
  0x82   :  { %1521 = vmatpush.bf16.msra.mxu2 %v2494_v32  ;;  %v2013_v32 = vld [vmem:[#allocation5 + $0x8] sm:$0xf] }
  0x83   :  { %1495 = vmatpush.bf16.msra.mxu3 %v2238_v36  ;;  %v2637_v36 = vld [vmem:[#allocation5 + $0x4e8] sm:$0xf]  ;;  %v2014_v49 = vor.u32 %v2922_v35, %v2013_v32  ;;  %v2590_v32 = vor.u32 %v3066_v25, %v2589_v24  ;;  %v2920_v24 = vld [vmem:[#allocation5 + $0xc] sm:$0xf]  ;;  %v2015_v25 = vld [vmem:[#allocation5 + $0x18] sm:$0xf0] }
  0x84   :  { %1510 = vmatpush.bf16.msrb.mxu0 %v2334_v58  ;;  %v3110_v58 = vld [vmem:[#allocation5 + $0x5f4] sm:$0xf0]  ;;  %v2717_v35 = vld [vmem:[#allocation5 + $0x588] sm:$0xf] }
  0x85   :  { %1484 = vmatpush.bf16.msrb.mxu1 %v2078_v54  ;;  %v2638_v54 = vor.u32 %v3078_v37, %v2637_v36  ;;  %v3098_v36 = vld [vmem:[#allocation5 + $0x594] sm:$0xf0]  ;;  %v2573_v37 = vld [vmem:[#allocation5 + $0x468] sm:$0xf] }
  0x86   :  { %1522 = vmatpush.bf16.msra.mxu2 %v2478_v46  ;;  %v2781_v46 = vld [vmem:[#allocation5 + $0x608] sm:$0xf]  ;;  %v2718_v43 = vor.u32 %v3098_v36, %v2717_v35  ;;  %v3008_v35 = vld [vmem:[#allocation5 + $0x2cc] sm:$0xf]  ;;  %v2018_v36 = vor.u32 %v2920_v24, %v2015_v25 }
  0x87   :  { %1496 = vmatpush.bf16.msra.mxu3 %v2222_v50  ;;  %v2954_v50 = vld [vmem:[#allocation5 + $0x114] sm:$0xf0]  ;;  %v2782_v63 = vor.u32 %v3114_v47, %v2781_v46  ;;  %v3028_v24 = vld [vmem:[#allocation5 + $0x36c] sm:$0xf] }
  0x88   :  { %1511 = vmatpush.bf16.msrb.mxu0 %v2318_v7  ;;  %v2142_v2 = vor.u32 %v2954_v50, %v2141_v40  ;;  %v2968_v40 = vld [vmem:[#allocation5 + $0x18c] sm:$0xf]  ;;  %v3094_v50 = vld [vmem:[#allocation5 + $0x574] sm:$0xf0] }
  0x89   :  { %1485 = vmatpush.bf16.msrb.mxu1 %v2062_v4  ;;  %v2766_v4 = vor.u32 %v3110_v58, %v2765_v56  ;;  %v2210_v47 = vor.u32 %v2968_v40, %v2207_v41  ;;  %v2143_v40 = vld [vmem:[#allocation5 + $0x118] sm:$0xf0] }
  0x8a   :  { %1523 = vmatpush.bf16.msra.mxu2 %v2462_v62  ;;  %2788 = vmatmul.msk.bf16.vlgmr.msrb.gmra.mxu3 %vm1295_vm0, %v3348_v48  ;;  %v3074_v62 = vld [vmem:[#allocation5 + $0x4d4] sm:$0xf0] }
  0x8b   :  { %1497 = vmatpush.bf16.msra.mxu3 %v2206_v1  ;;  %v2255_v1 = vld [vmem:[#allocation5 + $0x1f8] sm:$0xf0]  ;;  %v2622_v7 = vor.u32 %v3074_v62, %v2621_v59  ;;  %v2928_v59 = vld [vmem:[#allocation5 + $0x4c] sm:$0xf]  ;;  %v2558_v62 = vor.u32 %v3058_v52, %v2557_v51 }
  0x8c   :  { %1512 = vmatpush.bf16.msrb.mxu0 %v2302_v20  ;;  %v2258_v8 = vor.u32 %v2980_v0, %v2255_v1  ;;  %v2606_v20 = vor.u32 %v3070_v13, %v2605_v12  ;;  %v2685_v0 = vld [vmem:[#allocation5 + $0x548] sm:$0xf]  ;;  %v3090_v1 = vld [vmem:[#allocation5 + $0x554] sm:$0xf0]  ;;  %v3072_v51 = vld [vmem:[#allocation5 + $0x4cc] sm:$0xf] }
  0x8d   :  { %1486 = vmatpush.bf16.msrb.mxu1 %v2046_v17  ;;  %v2669_v13 = vld [vmem:[#allocation5 + $0x528] sm:$0xf]  ;;  %v2623_v52 = vld [vmem:[#allocation5 + $0x4d8] sm:$0xf0] }
  0x8e   :  { %1524 = vmatpush.bf16.msra.mxu2 %v2446_v11  ;;  %v3106_v11 = vld [vmem:[#allocation5 + $0x5d4] sm:$0xf0] }
  0x8f   :  { %1498 = vmatpush.bf16.msra.mxu3 %v2190_v14  ;;  %v2976_v14 = vld [vmem:[#allocation5 + $0x1cc] sm:$0xf]  ;;  %v2750_v17 = vor.u32 %v3106_v11, %v2749_v10  ;;  %v2031_v10 = vld [vmem:[#allocation5 + $0x38] sm:$0xf0] }
  0x90   :  { %1513 = vmatpush.bf16.msrb.mxu0 %v2286_v33  ;;  %v2242_v21 = vor.u32 %v2976_v14, %v2239_v15  ;;  %v3086_v14 = vld [vmem:[#allocation5 + $0x534] sm:$0xf0]  ;;  %v2525_v15 = vld [vmem:[#allocation5 + $0x408] sm:$0xf] }
  0x91   :  { %1487 = vmatpush.bf16.msrb.mxu1 %v2030_v29 }
  0x92   :  { %1525 = vmatpush.bf16.msra.mxu2 %v2430_v23  ;;  %v3102_v23 = vld [vmem:[#allocation5 + $0x5b4] sm:$0xf0] }
  0x93   :  { %1499 = vmatpush.bf16.msra.mxu3 %v2174_v26  ;;  %v2972_v26 = vld [vmem:[#allocation5 + $0x1ac] sm:$0xf]  ;;  %v2734_v29 = vor.u32 %v3102_v23, %v2733_v22  ;;  %v2670_v22 = vor.u32 %v3086_v14, %v2669_v13  ;;  %v2653_v23 = vld [vmem:[#allocation5 + $0x508] sm:$0xf]  ;;  %v2463_v14 = vld [vmem:[#allocation5 + $0x398] sm:$0xf0] }
  0x94   :  { %1514 = vmatpush.bf16.msrb.mxu0 %v2270_v55  ;;  %v2226_v33 = vor.u32 %v2972_v26, %v2223_v27  ;;  %v2191_v55 = vld [vmem:[#allocation5 + $0x178] sm:$0xf0] }
  0x95   :  { %1488 = vmatpush.bf16.msrb.mxu1 %v2014_v49  ;;  %v2701_v49 = vld [vmem:[#allocation5 + $0x568] sm:$0xf] }
  0x96   :  { %1526 = vmatpush.bf16.msra.mxu2 %v2414_v38  ;;  %v3062_v38 = vld [vmem:[#allocation5 + $0x474] sm:$0xf0]  ;;  %v2702_v58 = vor.u32 %v3094_v50, %v2701_v49  ;;  %v2495_v50 = vld [vmem:[#allocation5 + $0x3d8] sm:$0xf0] }
  0x97   :  { %1500 = vmatpush.bf16.msra.mxu3 %v2158_v44  ;;  %1515 = vmatmul.bf16.vlgmr.msrb.gmra.mxu0 %v3336_v53  ;;  %v2932_v44 = vld [vmem:[#allocation5 + $0x6c] sm:$0xf]  ;;  %v2574_v46 = vor.u32 %v3062_v38, %v2573_v37  ;;  %v2367_v37 = vld [vmem:[#allocation5 + $0x2d8] sm:$0xf0] }
  0x98   :  { %1566 = vmatpush.bf16.msra.mxu0 %v2782_v63  ;;  %1489 = vmatmul.bf16.vlgmr.msrb.gmra.mxu1 %v3338_v57  ;;  %v2066_v56 = vor.u32 %v2932_v44, %v2063_v45  ;;  %v2952_v38 = vld [vmem:[#allocation5 + $0x10c] sm:$0xf] }
  0x99   :  { %1533 = vmatpush.bf16.msra.mxu1 %v2638_v54  ;;  %v2964_v54 = vld [vmem:[#allocation5 + $0x16c] sm:$0xf]  ;;  %v2146_v49 = vor.u32 %v2952_v38, %v2143_v40 }
  0x9a   :  { %1527 = vmatpush.bf16.msra.mxu2 %v2398_v61  ;;  %v2047_v61 = vld [vmem:[#allocation5 + $0x58] sm:$0xf0]  ;;  %v2194_v63 = vor.u32 %v2964_v54, %v2191_v55  ;;  %v3004_v55 = vld [vmem:[#allocation5 + $0x2ac] sm:$0xf] }
  0x9b   :  { %1501 = vmatpush.bf16.msra.mxu3 %v2142_v2  ;;  %v2541_v2 = vld [vmem:[#allocation5 + $0x428] sm:$0xf]  ;;  %v2050_v6 = vor.u32 %v2928_v59, %v2047_v61  ;;  %v2751_v59 = vld [vmem:[#allocation5 + $0x5d8] sm:$0xf0]  ;;  %v3024_v38 = vld [vmem:[#allocation5 + $0x34c] sm:$0xf] }
  0x9c   :  { %1585 = vmatpush.bf16.msrb.mxu0 %v2258_v8  ;;  %v2924_v8 = vld [vmem:[#allocation5 + $0x2c] sm:$0xf] }
  0x9d   :  { %1534 = vmatpush.bf16.msra.mxu1 %v2622_v7  ;;  %1528 = vmatmul.bf16.vlgmr.msra.gmra.mxu2 %v3340_v60  ;;  %v2686_v7 = vor.u32 %v3090_v1, %v2685_v0  ;;  %v2034_v19 = vor.u32 %v2924_v8, %v2031_v10  ;;  %v2479_v1 = vld [vmem:[#allocation5 + $0x3b8] sm:$0xf0] }
  0x9e   :  { %1572 = vmatpush.bf16.msrb.mxu2 %v2130_v3  ;;  %1502 = vmatmul.bf16.vlgmr.msra.gmra.mxu3 %v3344_v9  ;;  %v3054_v3 = vld [vmem:[#allocation5 + $0x434] sm:$0xf0]  ;;  %v2735_v8 = vld [vmem:[#allocation5 + $0x5b8] sm:$0xf0] }
  0x9f   :  { %1546 = vmatpush.bf16.msrb.mxu3 %v2766_v4  ;;  %v2960_v4 = vld [vmem:[#allocation5 + $0x14c] sm:$0xf]  ;;  %v2542_v11 = vor.u32 %v3054_v3, %v2541_v2  ;;  %v2607_v3 = vld [vmem:[#allocation5 + $0x4b8] sm:$0xf0] }
  0xa0   :  { %1586 = vmatpush.bf16.msrb.mxu0 %v2242_v21  ;;  %v2178_v12 = vor.u32 %v2960_v4, %v2175_v5  ;;  %v2383_v21 = vld [vmem:[#allocation5 + $0x2f8] sm:$0xf0]  ;;  %v3068_v2 = vld [vmem:[#allocation5 + $0x4ac] sm:$0xf] }
  0xa1   :  { %1535 = vmatpush.bf16.msra.mxu1 %v2606_v20  ;;  %v3012_v20 = vld [vmem:[#allocation5 + $0x2ec] sm:$0xf] }
  0xa2   :  { %1573 = vmatpush.bf16.msrb.mxu2 %v2114_v16  ;;  %v3050_v16 = vld [vmem:[#allocation5 + $0x414] sm:$0xf0]  ;;  %v2386_v31 = vor.u32 %v3012_v20, %v2383_v21  ;;  %v3000_v5 = vld [vmem:[#allocation5 + $0x28c] sm:$0xf]  ;;  %v2719_v21 = vld [vmem:[#allocation5 + $0x598] sm:$0xf0] }
  0xa3   :  { %1547 = vmatpush.bf16.msrb.mxu3 %v2750_v17  ;;  %v2956_v17 = vld [vmem:[#allocation5 + $0x12c] sm:$0xf]  ;;  %v2526_v26 = vor.u32 %v3050_v16, %v2525_v15  ;;  %v2591_v16 = vld [vmem:[#allocation5 + $0x498] sm:$0xf0] }
  0xa4   :  { %1587 = vmatpush.bf16.msrb.mxu0 %v2226_v33  ;;  %v2162_v27 = vor.u32 %v2956_v17, %v2159_v18  ;;  %v2639_v33 = vld [vmem:[#allocation5 + $0x4f8] sm:$0xf0]  ;;  %v3064_v15 = vld [vmem:[#allocation5 + $0x48c] sm:$0xf] }
  0xa5   :  { %1536 = vmatpush.bf16.msra.mxu1 %v2590_v32  ;;  %v3076_v32 = vld [vmem:[#allocation5 + $0x4ec] sm:$0xf] }
  0xa6   :  { %1574 = vmatpush.bf16.msrb.mxu2 %v2098_v28  ;;  %v3082_v28 = vld [vmem:[#allocation5 + $0x514] sm:$0xf0]  ;;  %v2642_v45 = vor.u32 %v3076_v32, %v2639_v33  ;;  %v2996_v18 = vld [vmem:[#allocation5 + $0x26c] sm:$0xf]  ;;  %v2703_v33 = vld [vmem:[#allocation5 + $0x578] sm:$0xf0] }
  0xa7   :  { %1548 = vmatpush.bf16.msrb.mxu3 %v2734_v29  ;;  %2789 = vmatmul.msk.bf16.vlgmr.msra.gmra.mxu0 %vm1295_vm0, %v3348_v48  ;;  %v3044_v29 = vld [vmem:[#allocation5 + $0x3ec] sm:$0xf]  ;;  %v2654_v41 = vor.u32 %v3082_v28, %v2653_v23  ;;  %v2594_v23 = vor.u32 %v3064_v15, %v2591_v16  ;;  %v2575_v28 = vld [vmem:[#allocation5 + $0x478] sm:$0xf0] }
  0xa8   :  { %1588 = vmatpush.bf16.msrb.mxu0 %v2210_v47  ;;  %v2514_v44 = vor.u32 %v3044_v29, %v2511_v30  ;;  %v2370_v47 = vor.u32 %v3008_v35, %v2367_v37  ;;  %v2992_v30 = vld [vmem:[#allocation5 + $0x24c] sm:$0xf] }
  0xa9   :  { %1537 = vmatpush.bf16.msra.mxu1 %v2574_v46  ;;  %v3040_v46 = vld [vmem:[#allocation5 + $0x3cc] sm:$0xf] }
  0xaa   :  { %1575 = vmatpush.bf16.msrb.mxu2 %v2082_v42  ;;  %v3108_v42 = vld [vmem:[#allocation5 + $0x5ec] sm:$0xf]  ;;  %v2498_v61 = vor.u32 %v3040_v46, %v2495_v50 }
  0xab   :  { %1549 = vmatpush.bf16.msrb.mxu3 %v2718_v43  ;;  %v2767_v43 = vld [vmem:[#allocation5 + $0x5f8] sm:$0xf0]  ;;  %v3092_v32 = vld [vmem:[#allocation5 + $0x56c] sm:$0xf] }
  0xac   :  { %1589 = vmatpush.bf16.msrb.mxu0 %v2194_v63  ;;  %v2770_v54 = vor.u32 %v3108_v42, %v2767_v43  ;;  %v3036_v63 = vld [vmem:[#allocation5 + $0x3ac] sm:$0xf]  ;;  %v2431_v42 = vld [vmem:[#allocation5 + $0x358] sm:$0xf0] }
  0xad   :  { %1538 = vmatpush.bf16.msra.mxu1 %v2558_v62  ;;  %v2626_v62 = vor.u32 %v3072_v51, %v2623_v52  ;;  %v2482_v10 = vor.u32 %v3036_v63, %v2479_v1  ;;  %v3056_v43 = vld [vmem:[#allocation5 + $0x44c] sm:$0xf]  ;;  %v2687_v51 = vld [vmem:[#allocation5 + $0x558] sm:$0xf0]  ;;  %v2434_v52 = vor.u32 %v3024_v38, %v2431_v42 }
  0xae   :  { %1576 = vmatpush.bf16.msrb.mxu2 %v2066_v56  ;;  %v2351_v56 = vld [vmem:[#allocation5 + $0x2b8] sm:$0xf0]  ;;  %v2988_v46 = vld [vmem:[#allocation5 + $0x22c] sm:$0xf] }
  0xaf   :  { %1550 = vmatpush.bf16.msrb.mxu3 %v2702_v58  ;;  %v3104_v58 = vld [vmem:[#allocation5 + $0x5cc] sm:$0xf]  ;;  %v2354_v0 = vor.u32 %v3004_v55, %v2351_v56 }
  0xb0   :  { %1590 = vmatpush.bf16.msrb.mxu0 %v2178_v12  ;;  %v2754_v4 = vor.u32 %v3104_v58, %v2751_v59  ;;  %v3032_v12 = vld [vmem:[#allocation5 + $0x38c] sm:$0xf]  ;;  %v2415_v58 = vld [vmem:[#allocation5 + $0x338] sm:$0xf0] }
  0xb1   :  { %1539 = vmatpush.bf16.msra.mxu1 %v2542_v11  ;;  %v2610_v11 = vor.u32 %v3068_v2, %v2607_v3  ;;  %v3088_v50 = vld [vmem:[#allocation5 + $0x54c] sm:$0xf]  ;;  %v2671_v3 = vld [vmem:[#allocation5 + $0x538] sm:$0xf0] }
  0xb2   :  { %1577 = vmatpush.bf16.msrb.mxu2 %v2050_v6  ;;  %v2335_v6 = vld [vmem:[#allocation5 + $0x298] sm:$0xf0]  ;;  %v3020_v55 = vld [vmem:[#allocation5 + $0x32c] sm:$0xf] }
  0xb3   :  { %1551 = vmatpush.bf16.msrb.mxu3 %v2686_v7  ;;  %v3100_v7 = vld [vmem:[#allocation5 + $0x5ac] sm:$0xf]  ;;  %v2338_v13 = vor.u32 %v3000_v5, %v2335_v6  ;;  %v3376_v20 = vpop.f32.mrf.mxu0  ;;  %v2783_v5 = vld [vmem:[#allocation5 + $0x618] sm:$0xf0] }
  0xb4   :  { %1591 = vmatpush.bf16.msrb.mxu0 %v2162_v27  ;;  %v2738_v17 = vor.u32 %v3100_v7, %v2735_v8  ;;  %v3060_v27 = vld [vmem:[#allocation5 + $0x46c] sm:$0xf]  ;;  %v3378_v29 = vpop.f32.mrf.mxu1  ;;  %v2418_v7 = vor.u32 %v3020_v55, %v2415_v58 }
  0xb5   :  { %1540 = vmatpush.bf16.msra.mxu1 %v2526_v26  ;;  %v2447_v26 = vld [vmem:[#allocation5 + $0x378] sm:$0xf0]  ;;  %v2578_v37 = vor.u32 %v3060_v27, %v2575_v28  ;;  %v3052_v59 = vld [vmem:[#allocation5 + $0x42c] sm:$0xf] }
  0xb6   :  { %1578 = vmatpush.bf16.msrb.mxu2 %v2034_v19  ;;  %v2319_v19 = vld [vmem:[#allocation5 + $0x278] sm:$0xf0]  ;;  %v2984_v63 = vld [vmem:[#allocation5 + $0x20c] sm:$0xf] }
  0xb7   :  { %1552 = vmatpush.bf16.msrb.mxu3 %v2670_v22  ;;  %v2466_v22 = vor.u32 %v3032_v12, %v2463_v14  ;;  %v2322_v25 = vor.u32 %v2996_v18, %v2319_v19  ;;  %v3084_v1 = vld [vmem:[#allocation5 + $0x52c] sm:$0xf]  ;;  %v3130_v28 = vld [vmem:[#allocation8 + $0x78] sm:$0xff] }
  0xb8   :  { %1541 = vmatmul.bf16.vlgmr.msra.gmra.mxu1 %v3352_v34  ;;  %1592 = vmatpush.bf16.msrb.mxu0 %v2146_v49  ;;  %v3016_v12 = vld [vmem:[#allocation5 + $0x30c] sm:$0xf]  ;;  %v2674_v15 = vor.u32 %v3084_v1, %v2671_v3 }
  0xb9   :  { %1598 = vmatpush.bf16.msrb.mxu1 %v2386_v31  ;;  %v2303_v31 = vld [vmem:[#allocation5 + $0x258] sm:$0xf0]  ;;  %v3048_v16 = vld [vmem:[#allocation5 + $0x40c] sm:$0xf] }
  0xba   :  { %1579 = vmatpush.bf16.msrb.mxu2 %v2018_v36  ;;  %v2450_v36 = vor.u32 %v3028_v24, %v2447_v26  ;;  %v2306_v40 = vor.u32 %v2992_v30, %v2303_v31  ;;  %v3080_v19 = vld [vmem:[#allocation5 + $0x50c] sm:$0xf]  ;;  %v3122_v24 = vld [vmem:[#allocation8 + $0x38] sm:$0xff] }
  0xbb   :  { %1553 = vmatpush.bf16.msrb.mxu3 %v2654_v41  ;;  %1593 = vmatmul.bf16.vlgmr.msrb.gmra.mxu0 %v3344_v9  ;;  %v3380_v35 = vpop.f32.mrf.mxu2  ;;  %v1310_v49 = vpop.f32.mrf.mxu0  ;;  %v3128_v38 = vld [vmem:[#allocation8 + $0x68] sm:$0xff] }
  0xbc   :  { %1637 = vmatpush.bf16.msra.mxu0 %v2770_v54  ;;  %v1323_v2 = vpop.f32.mrf.mxu1  ;;  %v3124_v55 = vld [vmem:[#allocation8 + $0x48] sm:$0xff] }
  0xbd   :  { %1599 = vmatpush.bf16.msrb.mxu1 %v2370_v47  ;;  %1580 = vmatmul.bf16.vlgmr.msrb.gmra.mxu2 %v3338_v57  ;;  %v3096_v57 = vld [vmem:[#allocation5 + $0x58c] sm:$0xf]  ;;  %v3382_v41 = vpop.f32.mrf.mxu3  ;;  %v2287_v47 = vld [vmem:[#allocation5 + $0x238] sm:$0xf0] }
  0xbe   :  { %1624 = vmatpush.bf16.msra.mxu2 %v2642_v45  ;;  %1554 = vmatmul.bf16.vlgmr.msrb.gmra.mxu3 %v3354_v39  ;;  %v2722_v9 = vor.u32 %v3096_v57, %v2719_v21  ;;  %v2706_v45 = vor.u32 %v3092_v32, %v2703_v33  ;;  %v2290_v56 = vor.u32 %v2988_v46, %v2287_v47  ;;  %v2655_v57 = vld [vmem:[#allocation5 + $0x518] sm:$0xf0]  ;;  %v3116_v47 = vld [vmem:[#allocation8 + $0x8] sm:$0xff] }
  0xbf   :  { %1611 = vmatpush.bf16.msra.mxu3 %v2514_v44  ;;  %v2559_v44 = vld [vmem:[#allocation5 + $0x458] sm:$0xf0] }
  0xc0   :  { %1638 = vmatpush.bf16.msra.mxu0 %v2754_v4  ;;  %v2562_v54 = vor.u32 %v3056_v43, %v2559_v44  ;;  %v3112_v4 = vld [vmem:[#allocation5 + $0x60c] sm:$0xf]  ;;  %v3126_v46 = vld [vmem:[#allocation8 + $0x58] sm:$0xff] }
  0xc1   :  { %1600 = vmatpush.bf16.msrb.mxu1 %v2354_v0  ;;  %v2271_v0 = vld [vmem:[#allocation5 + $0x218] sm:$0xf0]  ;;  %v2786_v18 = vor.u32 %v3112_v4, %v2783_v5 }
  0xc2   :  { %1625 = vmatpush.bf16.msra.mxu2 %v2626_v62  ;;  %v2690_v62 = vor.u32 %v3088_v50, %v2687_v51  ;;  %v3115_v51 = vld [vmem:[#allocation8] sm:$0xff]  ;;  %v3138_v5 = vld [vmem:[#allocation8 + $0xb8] sm:$0xff] }
  0xc3   :  { %1612 = vmatpush.bf16.msra.mxu3 %v2498_v61  ;;  %v2543_v61 = vld [vmem:[#allocation5 + $0x438] sm:$0xf0]  ;;  %v1336_v6 = vpop.f32.mrf.mxu2 }
  0xc4   :  { %1639 = vmatpush.bf16.msra.mxu0 %v2738_v17  ;;  %v2546_v8 = vor.u32 %v3052_v59, %v2543_v61  ;;  %v2527_v17 = vld [vmem:[#allocation5 + $0x418] sm:$0xf0]  ;;  %v3137_v6 = vld [vmem:[#allocation8 + $0xb0] sm:$0xff] }
  0xc5   :  { %1601 = vmatpush.bf16.msrb.mxu1 %v2338_v13  ;;  %v2399_v13 = vld [vmem:[#allocation5 + $0x318] sm:$0xf0]  ;;  %v1349_v14 = vpop.f32.mrf.mxu3 }
  0xc6   :  { %1626 = vmatpush.bf16.msra.mxu2 %v2610_v11  ;;  %v2274_v11 = vor.u32 %v2984_v63, %v2271_v0 }
  0xc7   :  { %1613 = vmatpush.bf16.msra.mxu3 %v2482_v10  ;;  %v3384_v10 = vld [vmem:[#allocation7] sm:$0xf] }
  0xc8   :  { %1640 = vmatpush.bf16.msra.mxu0 %v2722_v9  ;;  %v283_v21 = vperm.slane %v3384_v10, 0  ;;  %v3121_v9 = vld [vmem:[#allocation8 + $0x30] sm:$0xff]  ;;  %v284_v59 = vperm.slane %v3384_v10, 1 }
  0xc9   :  { %1602 = vmatpush.bf16.msrb.mxu1 %v2322_v25  ;;  %v2658_v25 = vor.u32 %v3080_v19, %v2655_v57  ;;  %v3134_v57 = vld [vmem:[#allocation8 + $0x98] sm:$0xff] }
  0xca   :  { %1627 = vmatpush.bf16.msra.mxu2 %v2594_v23  ;;  %v2530_v23 = vor.u32 %v3048_v16, %v2527_v17  ;;  %v1309_v26 = vadd.f32 %v3376_v20, %v283_v21  ;;  %v3120_v20 = vld [vmem:[#allocation8 + $0x28] sm:$0xff]  ;;  %v3133_v21 = vld [vmem:[#allocation8 + $0x90] sm:$0xff] }
  0xcb   :  { %1614 = vmatpush.bf16.msra.mxu3 %v2466_v22  ;;  %v2402_v22 = vor.u32 %v3016_v12, %v2399_v13  ;;  %v1386_v27 = vpop.f32.mrf.mxu2  ;;  %v3136_v13 = vld [vmem:[#allocation8 + $0xa8] sm:$0xff] }
  0xcc   :  { %1641 = vmatpush.bf16.msra.mxu0 %v2706_v45  ;;  %v1322_v30 = vadd.f32 %v3378_v29, %v1309_v26  ;;  %v3118_v29 = vld [vmem:[#allocation8 + $0x18] sm:$0xff] }
  0xcd   :  { %1603 = vmatpush.bf16.msrb.mxu1 %v2306_v40 }
  0xce   :  { %1628 = vmatpush.bf16.msra.mxu2 %v2578_v37  ;;  %v1335_v32 = vadd.f32 %v3380_v35, %v1322_v30  ;;  %v3119_v37 = vld [vmem:[#allocation8 + $0x20] sm:$0xff]  ;;  %v3117_v35 = vld [vmem:[#allocation8 + $0x10] sm:$0xff] }
  0xcf   :  { %1615 = vmatpush.bf16.msra.mxu3 %v2450_v36  ;;  %v3131_v30 = vld [vmem:[#allocation8 + $0x80] sm:$0xff] }
  0xd0   :  { %1642 = vmatpush.bf16.msra.mxu0 %v2690_v62 }
  0xd1   :  { %1604 = vmatpush.bf16.msrb.mxu1 %v2290_v56  ;;  %v3123_v56 = vld [vmem:[#allocation8 + $0x40] sm:$0xff] }
  0xd2   :  { %1629 = vmatpush.bf16.msra.mxu2 %v2562_v54 }
  0xd3   :  { %1616 = vmatpush.bf16.msra.mxu3 %v2434_v52  ;;  %v1388_v36 = vpop.f32.mrf.mxu2 }
  0xd4   :  { %1643 = vmatpush.bf16.msra.mxu0 %v2674_v15  ;;  %v1360_v31 = vpop.f32.mrf.mxu0  ;;  %v3135_v15 = vld [vmem:[#allocation8 + $0xa0] sm:$0xff] }
  0xd5   :  { %1605 = vmatpush.bf16.msrb.mxu1 %v2274_v11  ;;  %v1373_v33 = vpop.f32.mrf.mxu1 }
  0xd6   :  { %1630 = vmatpush.bf16.msra.mxu2 %v2546_v8 }
  0xd7   :  { %1617 = vmatpush.bf16.msra.mxu3 %v2418_v7 }
  0xd8   :  { %1606 = vmatmul.bf16.vlgmr.msrb.gmra.mxu1 %v3336_v53  ;;  %1644 = vmatpush.bf16.msra.mxu0 %v2658_v25  ;;  %v3129_v53 = vld [vmem:[#allocation8 + $0x70] sm:$0xff]  ;;  %v3132_v25 = vld [vmem:[#allocation8 + $0x88] sm:$0xff] }
  0xd9   :  { %1657 = vmatpush.bf16.msra.mxu1 %v2786_v18 }
  0xda   :  { %1631 = vmatpush.bf16.msra.mxu2 %v2530_v23 }
  0xdb   :  { %1618 = vmatpush.bf16.msra.mxu3 %v2402_v22  ;;  %1645 = vmatmul.bf16.vlgmr.msra.gmra.mxu0 %v3354_v39  ;;  %v3127_v39 = vld [vmem:[#allocation8 + $0x60] sm:$0xff] }
  0xdc   :  { %v1362_v42 = vpop.f32.mrf.mxu0 }
  0xdd   :  { %1944 = vmatpush.bf16.msrb.mxu1 %v3130_v28  ;;  %1632 = vmatmul.bf16.vlgmr.msra.gmra.mxu2 %v3352_v34  ;;  %v1399_v40 = vpop.f32.mrf.mxu3  ;;  %v1375_v43 = vpop.f32.mrf.mxu1 }
  0xde   :  { %1619 = vmatmul.bf16.vlgmr.msra.gmra.mxu3 %v3340_v60  ;;  %v1348_v60 = vadd.f32 %v3382_v41, %v1335_v32  ;;  %v3125_v41 = vld [vmem:[#allocation8 + $0x50] sm:$0xff]  ;;  %v1400_v62 = vadd.f32 %v1399_v40, %v284_v59  ;;  %1957 = vmatpush.bf16.msrb.mxu2 %v3138_v5  ;;  %v286_v59 = vperm.slane %v3384_v10, 3 }
  0xdf   :  { %1931 = vmatpush.bf16.msrb.mxu3 %v3122_v24  ;;  %v3145_v32 = vld [vmem:[#allocation8 + $0xf0] sm:$0xff] }
  0xe0   :  { %v1361_v34 = vadd.f32 %v1360_v31, %v1348_v60  ;;  %v1412_v44 = vpop.f32.mrf.mxu2  ;;  %v3144_v60 = vld [vmem:[#allocation8 + $0xe8] sm:$0xff] }
  0xe1   :  { %1945 = vmatpush.bf16.msrb.mxu1 %v3129_v53  ;;  %v1413_v2 = vadd.f32 %v1412_v44, %v1400_v62 }
  0xe2   :  { %v1374_v45 = vadd.f32 %v1373_v33, %v1361_v34  ;;  %1958 = vmatpush.bf16.msrb.mxu2 %v3137_v6  ;;  %v285_v33 = vperm.slane %v3384_v10, 2  ;;  %v3143_v34 = vld [vmem:[#allocation8 + $0xe0] sm:$0xff] }
  0xe3   :  { %1932 = vmatpush.bf16.msrb.mxu3 %v3121_v9 }
  0xe4   :  { %v1387_v49 = vadd.f32 %v1386_v27, %v1374_v45 }
  0xe5   :  { %1946 = vmatpush.bf16.msrb.mxu1 %v3128_v38  ;;  %v1401_v50 = vpop.f32.mrf.mxu3 }
  0xe6   :  { %v1663_v54 = vmax.f32 %v1387_v49, 0.0  ;;  %1959 = vmatpush.bf16.msrb.mxu2 %v3136_v13 }
  0xe7   :  { %1933 = vmatpush.bf16.msrb.mxu3 %v3120_v20  ;;  %v3146_v20 = vld [vmem:[#allocation8 + $0xf8] sm:$0xff] }
  0xe8   :  { %2790 = vmatmul.msk.bf16.vlgmr.msra.gmra.mxu1 %vm1295_vm0, %v3348_v48  ;;  %v1414_v52 = vpop.f32.mrf.mxu2  ;;  %v1667_v48 = vpack.c.bf16 %v1663_v54, %v1663_v54  ;;  %1970 = vmatpush.bf16.msrb.mxu0 %v3146_v20 }
  0xe9   :  { %1947 = vmatpush.bf16.msrb.mxu1 %v3127_v39  ;;  %v3142_v39 = vld [vmem:[#allocation8 + $0xd8] sm:$0xff] }
  0xea   :  { %1960 = vmatpush.bf16.msrb.mxu2 %v3135_v15 }
  0xeb   :  { %1934 = vmatpush.bf16.msrb.mxu3 %v3119_v37 }
  0xec   :  { %1971 = vmatpush.bf16.msrb.mxu0 %v3145_v32 }
  0xed   :  { %1948 = vmatpush.bf16.msrb.mxu1 %v3126_v46  ;;  %v3141_v46 = vld [vmem:[#allocation8 + $0xd0] sm:$0xff] }
  0xee   :  { %1961 = vmatpush.bf16.msrb.mxu2 %v3134_v57 }
  0xef   :  { %1935 = vmatpush.bf16.msrb.mxu3 %v3118_v29 }
  0xf0   :  { %1972 = vmatpush.bf16.msrb.mxu0 %v3144_v60 }
  0xf1   :  { %1949 = vmatpush.bf16.msrb.mxu1 %v3125_v41 }
  0xf2   :  { %1962 = vmatpush.bf16.msrb.mxu2 %v3133_v21 }
  0xf3   :  { %1936 = vmatpush.bf16.msrb.mxu3 %v3117_v35 }
  0xf4   :  { %v1425_v58 = vpop.f32.mrf.mxu0  ;;  %1973 = vmatpush.bf16.msrb.mxu0 %v3143_v34 }
  0xf5   :  { %1950 = vmatpush.bf16.msrb.mxu1 %v3124_v55  ;;  %v1438_v61 = vpop.f32.mrf.mxu1  ;;  %v1426_v4 = vadd.f32 %v1425_v58, %v1413_v2 }
  0xf6   :  { %1963 = vmatpush.bf16.msrb.mxu2 %v3132_v25 }
  0xf7   :  { %1937 = vmatpush.bf16.msrb.mxu3 %v3116_v47  ;;  %v1439_v8 = vadd.f32 %v1438_v61, %v1426_v4 }
  0xf8   :  { %1974 = vmatpush.bf16.msrb.mxu0 %v3142_v39 }
  0xf9   :  { %1951 = vmatpush.bf16.msrb.mxu1 %v3123_v56 }
  0xfa   :  { %1964 = vmatpush.bf16.msrb.mxu2 %v3131_v30 }
  0xfb   :  { %1938 = vmatpush.bf16.msrb.mxu3 %v3115_v51  ;;  %v3140_v51 = vld [vmem:[#allocation8 + $0xc8] sm:$0xff] }
  0xfc   :  { %v1427_v0 = vpop.f32.mrf.mxu0  ;;  %1975 = vmatpush.bf16.msrb.mxu0 %v3141_v46 }
  0xfd   :  { %v1451_v63 = vpop.f32.mrf.mxu3  ;;  %v1440_v3 = vpop.f32.mrf.mxu1 }
  0xfe   :  { %1939 = vmatmul.bf16.vlgmr.msrb.gmra.mxu3 %v1667_v48  ;;  %v1452_v12 = vadd.f32 %v1451_v63, %v1439_v8  ;;  %v3139_v48 = vld [vmem:[#allocation8 + $0xc0] sm:$0xff] }
 0x100   :  { %v1464_v1 = vpop.f32.mrf.mxu2  ;;  %1976 = vmatpush.bf16.msrb.mxu0 %v3140_v51 }
 0x101   :  { %v1465_v14 = vadd.f32 %v1464_v1, %v1452_v12 }
 0x104   :  { %1977 = vmatpush.bf16.msrb.mxu0 %v3139_v48 }
 0x105   :  { %v1453_v7 = vpop.f32.mrf.mxu3 }
 0x108   :  { %v1466_v11 = vpop.f32.mrf.mxu2 }
 0x10d   :  { %v1477_v16 = vpop.f32.mrf.mxu3 }
 0x10e   :  { %v1478_v17 = vadd.f32 %v1477_v16, %v1465_v14 }
 0x110   :  { %v1664_v18 = vmax.f32 %v1478_v17, 0.0 }
 0x112   :  { %v1668_v19 = vpack.c.bf16 %v1664_v18, %v1664_v18 }
 0x114   :  { %1952 = vmatmul.bf16.vlgmr.msrb.gmra.mxu1 %v1668_v19  ;;  %v1516_v23 = vpop.f32.mrf.mxu0  ;;  %v3156_v19 = vld [vmem:[%s3410_s4] ss:$0 sm:$0xff] }
 0x115   :  { %v1479_v22 = vpop.f32.mrf.mxu3  ;;  %v1490_v24 = vpop.f32.mrf.mxu1 }
 0x116   :  { %v1491_v37 = vadd.f32 %v1490_v24, %v285_v33 }
 0x11c   :  { %v1518_v27 = vpop.f32.mrf.mxu0 }
 0x11d   :  { %v1492_v9 = vpop.f32.mrf.mxu1 }
 0x120   :  { %v1529_v28 = vpop.f32.mrf.mxu2 }
 0x121   :  { %v1503_v26 = vpop.f32.mrf.mxu3 }
 0x122   :  { %v1504_v29 = vadd.f32 %v1503_v26, %v1491_v37 }
 0x124   :  { %v1568_v53 = vpop.f32.mrf.mxu0  ;;  %v1517_v42 = vadd.f32 %v1516_v23, %v1504_v29 }
 0x126   :  { %v1530_v43 = vadd.f32 %v1529_v28, %v1517_v42 }
 0x128   :  { %v1531_v36 = vpop.f32.mrf.mxu2 }
 0x129   :  { %v1505_v31 = vpop.f32.mrf.mxu3 }
 0x12c   :  { %v1570_v38 = vpop.f32.mrf.mxu0 }
 0x135   :  { %v1542_v40 = vpop.f32.mrf.mxu1 }
 0x136   :  { %v1543_v44 = vadd.f32 %v1542_v40, %v1530_v43 }
 0x138   :  { %v1594_v35 = vpop.f32.mrf.mxu0 }
 0x13d   :  { %v1544_v45 = vpop.f32.mrf.mxu1 }
 0x140   :  { %v1581_v49 = vpop.f32.mrf.mxu2  ;;  %v1596_v54 = vpop.f32.mrf.mxu0 }
 0x141   :  { %v1555_v47 = vpop.f32.mrf.mxu3  ;;  %v1582_v61 = vadd.f32 %v1581_v49, %v286_v59 }
 0x142   :  { %v1556_v41 = vadd.f32 %v1555_v47, %v1543_v44 }
 0x143   :  { %v1595_v63 = vadd.f32 %v1594_v35, %v1582_v61 }
 0x144   :  { %v1569_v50 = vadd.f32 %v1568_v53, %v1556_v41 }
 0x146   :  { %v1665_v52 = vmax.f32 %v1569_v50, 0.0 }
 0x148   :  { %v1669_v55 = vpack.c.bf16 %v1665_v52, %v1665_v52  ;;  %v1583_v58 = vpop.f32.mrf.mxu2 }
 0x149   :  { %v1557_v56 = vpop.f32.mrf.mxu3 }
 0x14a   :  { %1965 = vmatmul.bf16.vlgmr.msrb.gmra.mxu2 %v1669_v55 }
 0x155   :  { %v1607_v62 = vpop.f32.mrf.mxu1 }
 0x156   :  { %v1608_v1 = vadd.f32 %v1607_v62, %v1595_v63 }
 0x158   :  { %v1646_v0 = vpop.f32.mrf.mxu0 }
 0x15d   :  { %v1609_v2 = vpop.f32.mrf.mxu1 }
 0x160   :  { %v1633_v5 = vpop.f32.mrf.mxu2  ;;  %v1648_v7 = vpop.f32.mrf.mxu0 }
 0x161   :  { %v1620_v3 = vpop.f32.mrf.mxu3 }
 0x162   :  { %v1621_v4 = vadd.f32 %v1620_v3, %v1608_v1 }
 0x164   :  { %v1634_v6 = vadd.f32 %v1633_v5, %v1621_v4 }
 0x165   :  { %v1659_v11 = vpop.f32.mrf.mxu1 }
 0x166   :  { %v1647_v8 = vadd.f32 %v1646_v0, %v1634_v6 }
 0x168   :  { %v1660_v12 = vadd.f32 %v1659_v11, %v1647_v8  ;;  %v1635_v14 = vpop.f32.mrf.mxu2 }
 0x169   :  { %v1622_v13 = vpop.f32.mrf.mxu3 }
 0x16a   :  { %v1666_v15 = vmax.f32 %v1660_v12, 0.0 }
 0x16c   :  { %v1670_v16 = vpack.c.bf16 %v1666_v15, %v1666_v15 }
 0x16d   :  { %v1661_v10 = vpop.f32.mrf.mxu1 }
 0x16e   :  { %1978 = vmatmul.bf16.vlgmr.msrb.gmra.mxu0 %v1670_v16 }
 0x181   :  { %v1940_v17 = vpop.f32.mrf.mxu3 }
 0x182   :  { %v1941_v57 = vadd.f32 %v3156_v19, %v1940_v17 }
 0x189   :  { %v1942_v18 = vpop.f32.mrf.mxu3 }
 0x191   :  { %v1953_v21 = vpop.f32.mrf.mxu1 }
 0x192   :  { %v1954_v22 = vadd.f32 %v1953_v21, %v1941_v57 }
 0x199   :  { %v1955_v23 = vpop.f32.mrf.mxu1 }
 0x1cd   :  { %v1966_v24 = vpop.f32.mrf.mxu2 }
 0x1ce   :  { %v1967_v26 = vadd.f32 %v1966_v24, %v1954_v22 }
 0x1d5   :  { %v1968_v25 = vpop.f32.mrf.mxu2 }
 0x1eb   :  { %v1979_v27 = vpop.f32.mrf.mxu0 }
 0x1ec   :  { %v1980_v28 = vadd.f32 %v1979_v27, %v1967_v26 }
 0x1ee   :  { %1983 = vst [vmem:[#allocation10] sm:$0xff] %v1980_v28 }
 0x1ef   :  { %1994 = dma.vmem_to_hbm [thread:$0]  %s1990_s16, 128, %s1992_s19, [#allocation4]  }
 0x1f3   :  { %v1981_v9 = vpop.f32.mrf.mxu0 }
 0x1f4   :  { %3283 = dma.done.wait [#allocation4], 128  }
 0x1f5   :  { %3284 = vsyncadd [#allocation4], 4294967168 }
 0x1f6   :  { %1999 = vsyncpa [#allocation3], 1 }
 0x1f7   :  { %2000 = vsyncpa [#allocation6], 1 }
 0x1f8   :  { %2001 = vsyncpa [#allocation9], 1 }
 0x1f9   :  { %2002 = vsyncpa [#allocation4], 1 }

</bundles_post_ra>
